<compile_context>
chip_gen: v7x
topology: tpu7x:2x2x1
jax: 0.10.0
libtpu: 0.0.40
codegen_flags: <defaults>
</compile_context>

<pallas_src>
import jax
import jax.numpy as jnp
from jax.experimental import pallas as pl
from jax.experimental.pallas import tpu as pltpu

BN_EPS = 1e-5


def _pick_tm(M, max_tm=1024):
    """Lane tile: a multiple of 128 dividing M (>=2 tiles when possible),
    otherwise the full M (full-dim blocks are always legal)."""
    if M % 128 != 0:
        return M
    tm = min(max_tm, M)
    if tm == M and M >= 256:
        tm = M // 2
    while tm >= 128 and (M % tm != 0 or tm % 128 != 0):
        tm -= 128
    return tm if tm >= 128 else M


# ----------------------------- Pallas kernels ------------------------------ #
def _phase_matmul_stats_kernel(x_ref, w_ref, y_ref, s1_ref, s2_ref):
    # y = W_phase (Cout,K) @ X_phase_tile (K,tm); bf16 inputs, f32 accumulate.
    y = jnp.dot(w_ref[0], x_ref[0], preferred_element_type=jnp.float32)
    y_ref[...] = y[None]
    # fused BatchNorm partial statistics for this (phase, tile)
    s1_ref[...] = jnp.sum(y, axis=1, keepdims=True)[None, None]
    s2_ref[...] = jnp.sum(y * y, axis=1, keepdims=True)[None, None]


def _phase_matmul_bias_tanh_kernel(x_ref, w_ref, b_ref, y_ref):
    y = jnp.dot(w_ref[0], x_ref[0], preferred_element_type=jnp.float32)
    y_ref[...] = jnp.tanh(y + b_ref[...])[None]


def _affine_relu_kernel(y_ref, scale_ref, shift_ref, o_ref):
    o_ref[...] = jnp.maximum(y_ref[...] * scale_ref[...] + shift_ref[...], 0.0)


# --------------------------- pallas_call wrappers --------------------------- #
def phase_conv_stats(xp, wp):
    """xp: (P, K, M) bf16, wp: (P, Cout, K) bf16 ->
       y (P, Cout, M) f32, s1/s2 (P, nmt, Cout, 1) f32 partial BN sums."""
    P, K, M = xp.shape
    Cout = wp.shape[1]
    tm = _pick_tm(M)
    nmt = M // tm
    return pl.pallas_call(
        _phase_matmul_stats_kernel,
        out_shape=(
            jax.ShapeDtypeStruct((P, Cout, M), jnp.float32),
            jax.ShapeDtypeStruct((P, nmt, Cout, 1), jnp.float32),
            jax.ShapeDtypeStruct((P, nmt, Cout, 1), jnp.float32),
        ),
        grid=(P, nmt),
        in_specs=[
            pl.BlockSpec((1, K, tm), lambda p, i: (p, 0, i)),
            pl.BlockSpec((1, Cout, K), lambda p, i: (p, 0, 0)),
        ],
        out_specs=(
            pl.BlockSpec((1, Cout, tm), lambda p, i: (p, 0, i)),
            pl.BlockSpec((1, 1, Cout, 1), lambda p, i: (p, i, 0, 0)),
            pl.BlockSpec((1, 1, Cout, 1), lambda p, i: (p, i, 0, 0)),
        ),
        compiler_params=pltpu.CompilerParams(
            dimension_semantics=("parallel", "parallel")),
    )(xp, wp)


def phase_conv_bias_tanh(xp, wp, bias):
    """Final layer: per-phase matmul + bias + tanh. bias: (Cout, 1) f32."""
    P, K, M = xp.shape
    Cout = wp.shape[1]
    tm = _pick_tm(M)
    return pl.pallas_call(
        _phase_matmul_bias_tanh_kernel,
        out_shape=jax.ShapeDtypeStruct((P, Cout, M), jnp.float32),
        grid=(P, M // tm),
        in_specs=[
            pl.BlockSpec((1, K, tm), lambda p, i: (p, 0, i)),
            pl.BlockSpec((1, Cout, K), lambda p, i: (p, 0, 0)),
            pl.BlockSpec((Cout, 1), lambda p, i: (0, 0)),
        ],
        out_specs=pl.BlockSpec((1, Cout, tm), lambda p, i: (p, 0, i)),
        compiler_params=pltpu.CompilerParams(
            dimension_semantics=("parallel", "parallel")),
    )(xp, wp, bias)


def affine_relu(y2d, scale, shift):
    """relu(y*scale + shift); y (C, M) f32, scale/shift (C, 1) f32."""
    C, M = y2d.shape
    tm = _pick_tm(M)
    return pl.pallas_call(
        _affine_relu_kernel,
        out_shape=jax.ShapeDtypeStruct((C, M), jnp.float32),
        grid=(M // tm,),
        in_specs=[
            pl.BlockSpec((C, tm), lambda i: (0, i)),
            pl.BlockSpec((C, 1), lambda i: (0, 0)),
            pl.BlockSpec((C, 1), lambda i: (0, 0)),
        ],
        out_specs=pl.BlockSpec((C, tm), lambda i: (0, i)),
        compiler_params=pltpu.CompilerParams(dimension_semantics=("parallel",)),
    )(y2d, scale, shift)


# ------------------------------- JAX glue ----------------------------------- #
# For ConvT(k=4, s=2, p=1): per output-row parity r, the taps on the 1-padded
# input are (padded-offset, kernel-row-index):
_R_TAPS = {0: ((0, 3), (1, 1)), 1: ((1, 2), (2, 0))}
_PHASES = ((0, 0), (0, 1), (1, 0), (1, 1))


def _stride2_phase_operands(x, w_t):
    """x: (Cin, N, H, W); w_t: (Cin, Cout, 4, 4) (PyTorch ConvT layout).
    Returns XP (4, 4*Cin, N*H*W) bf16 and WP (4, Cout, 4*Cin) bf16."""
    Cin, N, H, W = x.shape
    Cout = w_t.shape[1]
    M = N * H * W
    xpad = jnp.pad(x.astype(jnp.bfloat16), ((0, 0), (0, 0), (1, 1), (1, 1)))
    xs, ws = [], []
    for ry, rx in _PHASES:
        taps = [((da, db), (wi, wj))
                for (da, wi) in _R_TAPS[ry] for (db, wj) in _R_TAPS[rx]]
        xt = jnp.stack([xpad[:, :, da:da + H, db:db + W] for (da, db), _ in taps],
                       axis=0)                                  # (4, Cin, N, H, W)
        xs.append(xt.reshape(4 * Cin, M))
        wt = jnp.stack([w_t[:, :, wi, wj] for _, (wi, wj) in taps], axis=0)
        ws.append(jnp.transpose(wt, (2, 0, 1)).reshape(Cout, 4 * Cin))
    return jnp.stack(xs), jnp.stack(ws).astype(jnp.bfloat16)


def _interleave_stride2_phases(y_all, Cout, N, H, W):
    """(4, Cout, N*H*W) phase outputs -> (Cout, N, 2H, 2W)."""
    y = y_all.reshape(2, 2, Cout, N, H, W)
    return jnp.transpose(y, (2, 3, 4, 0, 5, 1)).reshape(Cout, N, 2 * H, 2 * W)


def _layer1_phase_operands(z, w_t):
    """ConvT(k=4, s=1, p=0) on a 1x1 input: 16 single-tap matmuls (K = Cin).
    z: (Cin, N); w_t: (Cin, Cout, 4, 4)."""
    Cin, N = z.shape
    Cout = w_t.shape[1]
    XP = jnp.broadcast_to(z.astype(jnp.bfloat16)[None], (16, Cin, N))
    WP = jnp.transpose(w_t, (2, 3, 1, 0)).reshape(16, Cout, Cin).astype(jnp.bfloat16)
    return XP, WP


def _bn_scale_shift(s1, s2, gamma, beta, m_total):
    total = jnp.sum(s1, axis=(0, 1))[:, 0]            # (Cout,)
    total_sq = jnp.sum(s2, axis=(0, 1))[:, 0]
    mean = total / m_total
    var = jnp.maximum(total_sq / m_total - mean * mean, 0.0)   # biased, clamped
    scale = gamma * jax.lax.rsqrt(var + BN_EPS)
    shift = beta - mean * scale
    return scale.reshape(-1, 1), shift.reshape(-1, 1)


def _conv_block_first(z, w_t, gamma, beta):
    """ConvT(z_dim->Cout,4,1,0,bias=False) + BN(batch stats) + ReLU; z: (Cin,N)."""
    Cin, N = z.shape
    Cout = w_t.shape[1]
    XP, WP = _layer1_phase_operands(z, w_t)
    y_all, s1, s2 = phase_conv_stats(XP, WP)                   # (16, Cout, N)
    scale, shift = _bn_scale_shift(s1, s2, gamma, beta, 16 * N)
    y = jnp.transpose(y_all.reshape(4, 4, Cout, N), (2, 3, 0, 1))  # (Cout,N,4,4)
    y = affine_relu(y.reshape(Cout, N * 16), scale, shift)
    return y.reshape(Cout, N, 4, 4)


def _conv_block_stride2(x, w_t, gamma, beta):
    """ConvT(k=4,s=2,p=1,bias=False) + BN(batch stats) + ReLU; x: (Cin,N,H,W)."""
    Cin, N, H, W = x.shape
    Cout = w_t.shape[1]
    XP, WP = _stride2_phase_operands(x, w_t)
    y_all, s1, s2 = phase_conv_stats(XP, WP)
    scale, shift = _bn_scale_shift(s1, s2, gamma, beta, 4 * N * H * W)
    y = _interleave_stride2_phases(y_all, Cout, N, H, W)
    OH, OW = 2 * H, 2 * W
    y = affine_relu(y.reshape(Cout, N * OH * OW), scale, shift)
    return y.reshape(Cout, N, OH, OW)


def _final_layer(x, w_t, bias):
    """ConvT(k=4,s=2,p=1,bias=True) + tanh; x: (Cin,N,H,W) -> (Cout,N,2H,2W)."""
    Cin, N, H, W = x.shape
    Cout = w_t.shape[1]
    XP, WP = _stride2_phase_operands(x, w_t)
    y_all = phase_conv_bias_tanh(XP, WP, bias.reshape(Cout, 1).astype(jnp.float32))
    return _interleave_stride2_phases(y_all, Cout, N, H, W)


def generator_forward(params, x):
    """DCGAN generator: z (N, z_dim, 1, 1) NCHW -> image (N, C_img, 32, 32)."""
    N = x.shape[0]
    z = jnp.transpose(x.reshape(N, -1), (1, 0)).astype(jnp.float32)   # (z_dim, N)
    h = _conv_block_first(z, params["w1"], params["g1"], params["b1"])
    h = _conv_block_stride2(h, params["w2"], params["g2"], params["b2"])
    h = _conv_block_stride2(h, params["w3"], params["g3"], params["b3"])
    y = _final_layer(h, params["w4"], params["bias4"])                # (C,N,32,32)
    return jnp.transpose(y, (1, 0, 2, 3))                             # NCHW


def init_generator_params(key, model):
    z_dim = model["z_dim"]
    fm = model["features_multiplyer"]
    c_img = model["num_of_input_channels"]
    ks = jax.random.split(key, 10)

    def w(k, cin, cout):              # PyTorch ConvTranspose2d weight layout
        return 0.02 * jax.random.normal(k, (cin, cout, 4, 4), jnp.float32)

    return {
        "w1": w(ks[0], z_dim, fm * 8),
        "g1": 1.0 + 0.1 * jax.random.normal(ks[1], (fm * 8,), jnp.float32),
        "b1": 0.1 * jax.random.normal(ks[2], (fm * 8,), jnp.float32),
        "w2": w(ks[3], fm * 8, fm * 4),
        "g2": 1.0 + 0.1 * jax.random.normal(ks[4], (fm * 4,), jnp.float32),
        "b2": 0.1 * jax.random.normal(ks[5], (fm * 4,), jnp.float32),
        "w3": w(ks[6], fm * 4, fm * 2),
        "g3": 1.0 + 0.1 * jax.random.normal(ks[7], (fm * 2,), jnp.float32),
        "b3": 0.1 * jax.random.normal(ks[8], (fm * 2,), jnp.float32),
        "w4": w(ks[9], fm * 2, c_img),
        "bias4": 0.1 * jax.random.normal(jax.random.fold_in(key, 99), (c_img,),
                                         jnp.float32),
    }


# --------------------------- pure-JAX reference ------------------------------ #
def _convT_ref(x, w_t, bias, stride, padding):
    """Definition-faithful ConvTranspose2d (NCHW, PyTorch (Cin,Cout,k,k) weights)."""
    N, Cin, H, W = x.shape
    Cout, k = w_t.shape[1], w_t.shape[2]
    OH = (H - 1) * stride - 2 * padding + k
    OW = (W - 1) * stride - 2 * padding + k
    full = jnp.zeros((N, Cout, (H - 1) * stride + k, (W - 1) * stride + k),
                     jnp.float32)
    prod = jnp.einsum("nihw,iokl->noklhw", x, w_t)
    for i in range(k):
        for j in range(k):
            full = full.at[:, :, i:i + (H - 1) * stride + 1:stride,
                           j:j + (W - 1) * stride + 1:stride].add(prod[:, :, i, j])
    out = full[:, :, padding:padding + OH, padding:padding + OW]
    if bias is not None:
        out = out + bias.reshape(1, -1, 1, 1)
    return out


def generator_forward_ref(params, x):
    def block(h, w, g, b, s, p):
        y = _convT_ref(h, w, None, s, p)
        mean = jnp.mean(y, axis=(0, 2, 3), keepdims=True)
        var = jnp.mean((y - mean) ** 2, axis=(0, 2, 3), keepdims=True)
        yn = (y - mean) * jax.lax.rsqrt(var + BN_EPS)
        return jnp.maximum(yn * g.reshape(1, -1, 1, 1) + b.reshape(1, -1, 1, 1), 0.0)

    h = block(x, params["w1"], params["g1"], params["b1"], 1, 0)
    h = block(h, params["w2"], params["g2"], params["b2"], 2, 1)
    h = block(h, params["w3"], params["g3"], params["b3"], 2, 1)
    return jnp.tanh(_convT_ref(h, params["w4"], params["bias4"], 2, 1))


# TODO(synk): calculate_gen_loss is a static training helper that requires a
# Discriminator module; it is not part of Generator.forward and is not ported.

if __name__ == "__main__":
    Model = {"z_dim": 32, "features_multiplyer": 8, "num_of_input_channels": 3,
             "name": "DCgan"}
    key = jax.random.PRNGKey(0)
    kp, kx = jax.random.split(key)
    params = init_generator_params(kp, Model)

    batch = 2
    x = jax.random.normal(kx, (batch, Model["z_dim"], 1, 1), jnp.float32)

    out = jax.block_until_ready(jax.jit(generator_forward)(params, x))

    expected = (batch, Model["num_of_input_channels"], 32, 32)
    assert out.shape == expected, (out.shape, expected)
    assert bool(jnp.all(jnp.isfinite(out)))
    assert bool(jnp.all(jnp.abs(out) <= 1.0 + 1e-6))   # tanh range

    # numerical check vs. f32 pure-JAX reference (kernel uses bf16 matmul inputs)
    ref = jax.jit(generator_forward_ref)(params, x)
    max_err = float(jnp.max(jnp.abs(out - ref)))
    assert max_err < 5e-2, f"mismatch vs reference: max |diff| = {max_err}"

    print("KERNEL_OK")
</pallas_src>

<mosaic_0001>
module attributes {stable_mosaic.version = 11 : i64} {
  func.func @_phase_matmul_stats_kernel(%arg0: i32, %arg1: i32, %arg2: memref<1x32x2xbf16, #tpu.memory_space<vmem>>, %arg3: memref<1x64x32xbf16, #tpu.memory_space<vmem>>, %arg4: memref<1x64x2xf32, #tpu.memory_space<vmem>>, %arg5: memref<1x1x64x1xf32, #tpu.memory_space<vmem>>, %arg6: memref<1x1x64x1xf32, #tpu.memory_space<vmem>>) attributes {dimension_semantics = [#tpu.dimension_semantics<parallel>, #tpu.dimension_semantics<parallel>], iteration_bounds = array<i64: 16, 1>, scalar_prefetch = 0 : i64, scratch_operands = 0 : i64, tpu.core_type = #tpu.core_type<tc>, window_params = [{transform_indices = @transform_0, window_bounds = array<i64: 1, 32, 2>}, {transform_indices = @transform_1, window_bounds = array<i64: 1, 64, 32>}, {transform_indices = @transform_2, window_bounds = array<i64: 1, 64, 2>}, {transform_indices = @transform_3, window_bounds = array<i64: 1, 1, 64, 1>}, {transform_indices = @transform_4, window_bounds = array<i64: 1, 1, 64, 1>}]} {
    %c0 = arith.constant 0 : index
    %c0_0 = arith.constant 0 : index
    %c0_1 = arith.constant 0 : index
    %0 = vector.load %arg3[%c0, %c0_0, %c0_1] : memref<1x64x32xbf16, #tpu.memory_space<vmem>>, vector<1x64x32xbf16>
    %1 = vector.shape_cast %0 : vector<1x64x32xbf16> to vector<64x32xbf16>
    %c0_2 = arith.constant 0 : index
    %c0_3 = arith.constant 0 : index
    %c0_4 = arith.constant 0 : index
    %2 = vector.load %arg2[%c0_2, %c0_3, %c0_4] : memref<1x32x2xbf16, #tpu.memory_space<vmem>>, vector<1x32x2xbf16>
    %3 = vector.shape_cast %2 : vector<1x32x2xbf16> to vector<32x2xbf16>
    %cst = arith.constant dense<0.000000e+00> : vector<64x2xf32>
    %4 = tpu.matmul %1, %3, %cst {dimension_numbers = #tpu.dot_dimension_numbers<[1], [0], [0], [1], [0, 0, 1, 1], [], []>} : vector<64x32xbf16>, vector<32x2xbf16>, vector<64x2xf32> -> vector<64x2xf32>
    %5 = vector.shape_cast %4 : vector<64x2xf32> to vector<1x64x2xf32>
    %c0_5 = arith.constant 0 : index
    %c0_6 = arith.constant 0 : index
    %c0_7 = arith.constant 0 : index
    %6 = vector.load %arg4[%c0_5, %c0_6, %c0_7] : memref<1x64x2xf32, #tpu.memory_space<vmem>>, vector<1x64x2xf32>
    tpu.vector_store %arg4[%c0_5, %c0_6, %c0_7], %5 {strides = array<i32>} : memref<1x64x2xf32, #tpu.memory_space<vmem>>, vector<1x64x2xf32>,
    %cst_8 = arith.constant dense<0.000000e+00> : vector<64xf32>
    %7 = vector.multi_reduction <add>, %4, %cst_8 [1] : vector<64x2xf32> to vector<64xf32>
    %8 = vector.shape_cast %7 : vector<64xf32> to vector<64x1xf32>
    %9 = vector.shape_cast %8 : vector<64x1xf32> to vector<1x1x64x1xf32>
    %c0_9 = arith.constant 0 : index
    %c0_10 = arith.constant 0 : index
    %c0_11 = arith.constant 0 : index
    %c0_12 = arith.constant 0 : index
    %10 = vector.load %arg5[%c0_9, %c0_10, %c0_11, %c0_12] : memref<1x1x64x1xf32, #tpu.memory_space<vmem>>, vector<1x1x64x1xf32>
    tpu.vector_store %arg5[%c0_9, %c0_10, %c0_11, %c0_12], %9 {strides = array<i32>} : memref<1x1x64x1xf32, #tpu.memory_space<vmem>>, vector<1x1x64x1xf32>,
    %11 = arith.mulf %4, %4 : vector<64x2xf32>
    %cst_13 = arith.constant dense<0.000000e+00> : vector<64xf32>
    %12 = vector.multi_reduction <add>, %11, %cst_13 [1] : vector<64x2xf32> to vector<64xf32>
    %13 = vector.shape_cast %12 : vector<64xf32> to vector<64x1xf32>
    %14 = vector.shape_cast %13 : vector<64x1xf32> to vector<1x1x64x1xf32>
    %c0_14 = arith.constant 0 : index
    %c0_15 = arith.constant 0 : index
    %c0_16 = arith.constant 0 : index
    %c0_17 = arith.constant 0 : index
    %15 = vector.load %arg6[%c0_14, %c0_15, %c0_16, %c0_17] : memref<1x1x64x1xf32, #tpu.memory_space<vmem>>, vector<1x1x64x1xf32>
    tpu.vector_store %arg6[%c0_14, %c0_15, %c0_16, %c0_17], %14 {strides = array<i32>} : memref<1x1x64x1xf32, #tpu.memory_space<vmem>>, vector<1x1x64x1xf32>,
    return
  }
  func.func @transform_0(%arg0: i32, %arg1: i32) -> (i32, i32, i32) {
    %c0_i32 = arith.constant 0 : i32
    %c0_i32_0 = arith.constant 0 : i32
    return %arg0, %c0_i32, %arg1 : i32, i32, i32
  }
  func.func @transform_1(%arg0: i32, %arg1: i32) -> (i32, i32, i32) {
    %c0_i32 = arith.constant 0 : i32
    %c0_i32_0 = arith.constant 0 : i32
    %c0_i32_1 = arith.constant 0 : i32
    return %arg0, %c0_i32, %c0_i32_0 : i32, i32, i32
  }
  func.func @transform_2(%arg0: i32, %arg1: i32) -> (i32, i32, i32) {
    %c0_i32 = arith.constant 0 : i32
    %c0_i32_0 = arith.constant 0 : i32
    return %arg0, %c0_i32, %arg1 : i32, i32, i32
  }
  func.func @transform_3(%arg0: i32, %arg1: i32) -> (i32, i32, i32, i32) {
    %c0_i32 = arith.constant 0 : i32
    %c0_i32_0 = arith.constant 0 : i32
    %c0_i32_1 = arith.constant 0 : i32
    return %arg0, %arg1, %c0_i32, %c0_i32_0 : i32, i32, i32, i32
  }
  func.func @transform_4(%arg0: i32, %arg1: i32) -> (i32, i32, i32, i32) {
    %c0_i32 = arith.constant 0 : i32
    %c0_i32_0 = arith.constant 0 : i32
    %c0_i32_1 = arith.constant 0 : i32
    return %arg0, %arg1, %c0_i32, %c0_i32_0 : i32, i32, i32, i32
  }
}

module attributes {stable_mosaic.version = 11 : i64} {
  func.func @_affine_relu_kernel(%arg0: i32, %arg1: memref<64x32xf32, #tpu.memory_space<vmem>>, %arg2: memref<64x1xf32, #tpu.memory_space<vmem>>, %arg3: memref<64x1xf32, #tpu.memory_space<vmem>>, %arg4: memref<64x32xf32, #tpu.memory_space<vmem>>) attributes {dimension_semantics = [#tpu.dimension_semantics<parallel>], iteration_bounds = array<i64: 1>, scalar_prefetch = 0 : i64, scratch_operands = 0 : i64, tpu.core_type = #tpu.core_type<tc>, window_params = [{transform_indices = @transform_0, window_bounds = array<i64: 64, 32>}, {pipeline_mode = #tpu.pipeline_mode<synchronous>, transform_indices = @transform_1, window_bounds = array<i64: 64, 1>}, {pipeline_mode = #tpu.pipeline_mode<synchronous>, transform_indices = @transform_2, window_bounds = array<i64: 64, 1>}, {transform_indices = @transform_3, window_bounds = array<i64: 64, 32>}]} {
    %c0 = arith.constant 0 : index
    %c0_0 = arith.constant 0 : index
    %0 = vector.load %arg1[%c0, %c0_0] : memref<64x32xf32, #tpu.memory_space<vmem>>, vector<64x32xf32>
    %c0_1 = arith.constant 0 : index
    %c0_2 = arith.constant 0 : index
    %1 = vector.load %arg2[%c0_1, %c0_2] : memref<64x1xf32, #tpu.memory_space<vmem>>, vector<64x1xf32>
    %2 = vector.broadcast %1 : vector<64x1xf32> to vector<64x32xf32>
    %3 = arith.mulf %0, %2 : vector<64x32xf32>
    %c0_3 = arith.constant 0 : index
    %c0_4 = arith.constant 0 : index
    %4 = vector.load %arg3[%c0_3, %c0_4] : memref<64x1xf32, #tpu.memory_space<vmem>>, vector<64x1xf32>
    %5 = vector.broadcast %4 : vector<64x1xf32> to vector<64x32xf32>
    %6 = arith.addf %3, %5 : vector<64x32xf32>
    %cst = arith.constant 0.000000e+00 : f32
    %7 = vector.broadcast %cst : f32 to vector<64x32xf32>
    %8 = arith.maximumf %6, %7 : vector<64x32xf32>
    %c0_5 = arith.constant 0 : index
    %c0_6 = arith.constant 0 : index
    %9 = vector.load %arg4[%c0_5, %c0_6] : memref<64x32xf32, #tpu.memory_space<vmem>>, vector<64x32xf32>
    tpu.vector_store %arg4[%c0_5, %c0_6], %8 {strides = array<i32>} : memref<64x32xf32, #tpu.memory_space<vmem>>, vector<64x32xf32>,
    return
  }
  func.func @transform_0(%arg0: i32) -> (i32, i32) {
    %c0_i32 = arith.constant 0 : i32
    %c0_i32_0 = arith.constant 0 : i32
    return %c0_i32, %arg0 : i32, i32
  }
  func.func @transform_1(%arg0: i32) -> (i32, i32) {
    %c0_i32 = arith.constant 0 : i32
    %c0_i32_0 = arith.constant 0 : i32
    %c0_i32_1 = arith.constant 0 : i32
    return %c0_i32, %c0_i32_0 : i32, i32
  }
  func.func @transform_2(%arg0: i32) -> (i32, i32) {
    %c0_i32 = arith.constant 0 : i32
    %c0_i32_0 = arith.constant 0 : i32
    %c0_i32_1 = arith.constant 0 : i32
    return %c0_i32, %c0_i32_0 : i32, i32
  }
  func.func @transform_3(%arg0: i32) -> (i32, i32) {
    %c0_i32 = arith.constant 0 : i32
    %c0_i32_0 = arith.constant 0 : i32
    return %c0_i32, %arg0 : i32, i32
  }
}

module attributes {stable_mosaic.version = 11 : i64} {
  func.func @_phase_matmul_stats_kernel(%arg0: i32, %arg1: i32, %arg2: memref<1x256x32xbf16, #tpu.memory_space<vmem>>, %arg3: memref<1x32x256xbf16, #tpu.memory_space<vmem>>, %arg4: memref<1x32x32xf32, #tpu.memory_space<vmem>>, %arg5: memref<1x1x32x1xf32, #tpu.memory_space<vmem>>, %arg6: memref<1x1x32x1xf32, #tpu.memory_space<vmem>>) attributes {dimension_semantics = [#tpu.dimension_semantics<parallel>, #tpu.dimension_semantics<parallel>], iteration_bounds = array<i64: 4, 1>, scalar_prefetch = 0 : i64, scratch_operands = 0 : i64, tpu.core_type = #tpu.core_type<tc>, window_params = [{transform_indices = @transform_0, window_bounds = array<i64: 1, 256, 32>}, {transform_indices = @transform_1, window_bounds = array<i64: 1, 32, 256>}, {transform_indices = @transform_2, window_bounds = array<i64: 1, 32, 32>}, {transform_indices = @transform_3, window_bounds = array<i64: 1, 1, 32, 1>}, {transform_indices = @transform_4, window_bounds = array<i64: 1, 1, 32, 1>}]} {
    %c0 = arith.constant 0 : index
    %c0_0 = arith.constant 0 : index
    %c0_1 = arith.constant 0 : index
    %0 = vector.load %arg3[%c0, %c0_0, %c0_1] : memref<1x32x256xbf16, #tpu.memory_space<vmem>>, vector<1x32x256xbf16>
    %1 = vector.shape_cast %0 : vector<1x32x256xbf16> to vector<32x256xbf16>
    %c0_2 = arith.constant 0 : index
    %c0_3 = arith.constant 0 : index
    %c0_4 = arith.constant 0 : index
    %2 = vector.load %arg2[%c0_2, %c0_3, %c0_4] : memref<1x256x32xbf16, #tpu.memory_space<vmem>>, vector<1x256x32xbf16>
    %3 = vector.shape_cast %2 : vector<1x256x32xbf16> to vector<256x32xbf16>
    %cst = arith.constant dense<0.000000e+00> : vector<32x32xf32>
    %4 = tpu.matmul %1, %3, %cst {dimension_numbers = #tpu.dot_dimension_numbers<[1], [0], [0], [1], [0, 0, 1, 1], [], []>} : vector<32x256xbf16>, vector<256x32xbf16>, vector<32x32xf32> -> vector<32x32xf32>
    %5 = vector.shape_cast %4 : vector<32x32xf32> to vector<1x32x32xf32>
    %c0_5 = arith.constant 0 : index
    %c0_6 = arith.constant 0 : index
    %c0_7 = arith.constant 0 : index
    %6 = vector.load %arg4[%c0_5, %c0_6, %c0_7] : memref<1x32x32xf32, #tpu.memory_space<vmem>>, vector<1x32x32xf32>
    tpu.vector_store %arg4[%c0_5, %c0_6, %c0_7], %5 {strides = array<i32>} : memref<1x32x32xf32, #tpu.memory_space<vmem>>, vector<1x32x32xf32>,
    %cst_8 = arith.constant dense<0.000000e+00> : vector<32xf32>
    %7 = vector.multi_reduction <add>, %4, %cst_8 [1] : vector<32x32xf32> to vector<32xf32>
    %8 = vector.shape_cast %7 : vector<32xf32> to vector<32x1xf32>
    %9 = vector.shape_cast %8 : vector<32x1xf32> to vector<1x1x32x1xf32>
    %c0_9 = arith.constant 0 : index
    %c0_10 = arith.constant 0 : index
    %c0_11 = arith.constant 0 : index
    %c0_12 = arith.constant 0 : index
    %10 = vector.load %arg5[%c0_9, %c0_10, %c0_11, %c0_12] : memref<1x1x32x1xf32, #tpu.memory_space<vmem>>, vector<1x1x32x1xf32>
    tpu.vector_store %arg5[%c0_9, %c0_10, %c0_11, %c0_12], %9 {strides = array<i32>} : memref<1x1x32x1xf32, #tpu.memory_space<vmem>>, vector<1x1x32x1xf32>,
    %11 = arith.mulf %4, %4 : vector<32x32xf32>
    %cst_13 = arith.constant dense<0.000000e+00> : vector<32xf32>
    %12 = vector.multi_reduction <add>, %11, %cst_13 [1] : vector<32x32xf32> to vector<32xf32>
    %13 = vector.shape_cast %12 : vector<32xf32> to vector<32x1xf32>
    %14 = vector.shape_cast %13 : vector<32x1xf32> to vector<1x1x32x1xf32>
    %c0_14 = arith.constant 0 : index
    %c0_15 = arith.constant 0 : index
    %c0_16 = arith.constant 0 : index
    %c0_17 = arith.constant 0 : index
    %15 = vector.load %arg6[%c0_14, %c0_15, %c0_16, %c0_17] : memref<1x1x32x1xf32, #tpu.memory_space<vmem>>, vector<1x1x32x1xf32>
    tpu.vector_store %arg6[%c0_14, %c0_15, %c0_16, %c0_17], %14 {strides = array<i32>} : memref<1x1x32x1xf32, #tpu.memory_space<vmem>>, vector<1x1x32x1xf32>,
    return
  }
  func.func @transform_0(%arg0: i32, %arg1: i32) -> (i32, i32, i32) {
    %c0_i32 = arith.constant 0 : i32
    %c0_i32_0 = arith.constant 0 : i32
    return %arg0, %c0_i32, %arg1 : i32, i32, i32
  }
  func.func @transform_1(%arg0: i32, %arg1: i32) -> (i32, i32, i32) {
    %c0_i32 = arith.constant 0 : i32
    %c0_i32_0 = arith.constant 0 : i32
    %c0_i32_1 = arith.constant 0 : i32
    return %arg0, %c0_i32, %c0_i32_0 : i32, i32, i32
  }
  func.func @transform_2(%arg0: i32, %arg1: i32) -> (i32, i32, i32) {
    %c0_i32 = arith.constant 0 : i32
    %c0_i32_0 = arith.constant 0 : i32
    return %arg0, %c0_i32, %arg1 : i32, i32, i32
  }
  func.func @transform_3(%arg0: i32, %arg1: i32) -> (i32, i32, i32, i32) {
    %c0_i32 = arith.constant 0 : i32
    %c0_i32_0 = arith.constant 0 : i32
    %c0_i32_1 = arith.constant 0 : i32
    return %arg0, %arg1, %c0_i32, %c0_i32_0 : i32, i32, i32, i32
  }
  func.func @transform_4(%arg0: i32, %arg1: i32) -> (i32, i32, i32, i32) {
    %c0_i32 = arith.constant 0 : i32
    %c0_i32_0 = arith.constant 0 : i32
    %c0_i32_1 = arith.constant 0 : i32
    return %arg0, %arg1, %c0_i32, %c0_i32_0 : i32, i32, i32, i32
  }
}

module attributes {stable_mosaic.version = 11 : i64} {
  func.func @_affine_relu_kernel(%arg0: i32, %arg1: memref<32x128xf32, #tpu.memory_space<vmem>>, %arg2: memref<32x1xf32, #tpu.memory_space<vmem>>, %arg3: memref<32x1xf32, #tpu.memory_space<vmem>>, %arg4: memref<32x128xf32, #tpu.memory_space<vmem>>) attributes {dimension_semantics = [#tpu.dimension_semantics<parallel>], iteration_bounds = array<i64: 1>, scalar_prefetch = 0 : i64, scratch_operands = 0 : i64, tpu.core_type = #tpu.core_type<tc>, window_params = [{transform_indices = @transform_0, window_bounds = array<i64: 32, 128>}, {pipeline_mode = #tpu.pipeline_mode<synchronous>, transform_indices = @transform_1, window_bounds = array<i64: 32, 1>}, {pipeline_mode = #tpu.pipeline_mode<synchronous>, transform_indices = @transform_2, window_bounds = array<i64: 32, 1>}, {transform_indices = @transform_3, window_bounds = array<i64: 32, 128>}]} {
    %c0 = arith.constant 0 : index
    %c0_0 = arith.constant 0 : index
    %0 = vector.load %arg1[%c0, %c0_0] : memref<32x128xf32, #tpu.memory_space<vmem>>, vector<32x128xf32>
    %c0_1 = arith.constant 0 : index
    %c0_2 = arith.constant 0 : index
    %1 = vector.load %arg2[%c0_1, %c0_2] : memref<32x1xf32, #tpu.memory_space<vmem>>, vector<32x1xf32>
    %2 = vector.broadcast %1 : vector<32x1xf32> to vector<32x128xf32>
    %3 = arith.mulf %0, %2 : vector<32x128xf32>
    %c0_3 = arith.constant 0 : index
    %c0_4 = arith.constant 0 : index
    %4 = vector.load %arg3[%c0_3, %c0_4] : memref<32x1xf32, #tpu.memory_space<vmem>>, vector<32x1xf32>
    %5 = vector.broadcast %4 : vector<32x1xf32> to vector<32x128xf32>
    %6 = arith.addf %3, %5 : vector<32x128xf32>
    %cst = arith.constant 0.000000e+00 : f32
    %7 = vector.broadcast %cst : f32 to vector<32x128xf32>
    %8 = arith.maximumf %6, %7 : vector<32x128xf32>
    %c0_5 = arith.constant 0 : index
    %c0_6 = arith.constant 0 : index
    %9 = vector.load %arg4[%c0_5, %c0_6] : memref<32x128xf32, #tpu.memory_space<vmem>>, vector<32x128xf32>
    tpu.vector_store %arg4[%c0_5, %c0_6], %8 {strides = array<i32>} : memref<32x128xf32, #tpu.memory_space<vmem>>, vector<32x128xf32>,
    return
  }
  func.func @transform_0(%arg0: i32) -> (i32, i32) {
    %c0_i32 = arith.constant 0 : i32
    %c0_i32_0 = arith.constant 0 : i32
    return %c0_i32, %arg0 : i32, i32
  }
  func.func @transform_1(%arg0: i32) -> (i32, i32) {
    %c0_i32 = arith.constant 0 : i32
    %c0_i32_0 = arith.constant 0 : i32
    %c0_i32_1 = arith.constant 0 : i32
    return %c0_i32, %c0_i32_0 : i32, i32
  }
  func.func @transform_2(%arg0: i32) -> (i32, i32) {
    %c0_i32 = arith.constant 0 : i32
    %c0_i32_0 = arith.constant 0 : i32
    %c0_i32_1 = arith.constant 0 : i32
    return %c0_i32, %c0_i32_0 : i32, i32
  }
  func.func @transform_3(%arg0: i32) -> (i32, i32) {
    %c0_i32 = arith.constant 0 : i32
    %c0_i32_0 = arith.constant 0 : i32
    return %c0_i32, %arg0 : i32, i32
  }
}

module attributes {stable_mosaic.version = 11 : i64} {
  func.func @_phase_matmul_stats_kernel(%arg0: i32, %arg1: i32, %arg2: memref<1x128x128xbf16, #tpu.memory_space<vmem>>, %arg3: memref<1x16x128xbf16, #tpu.memory_space<vmem>>, %arg4: memref<1x16x128xf32, #tpu.memory_space<vmem>>, %arg5: memref<1x1x16x1xf32, #tpu.memory_space<vmem>>, %arg6: memref<1x1x16x1xf32, #tpu.memory_space<vmem>>) attributes {dimension_semantics = [#tpu.dimension_semantics<parallel>, #tpu.dimension_semantics<parallel>], iteration_bounds = array<i64: 4, 1>, scalar_prefetch = 0 : i64, scratch_operands = 0 : i64, tpu.core_type = #tpu.core_type<tc>, window_params = [{transform_indices = @transform_0, window_bounds = array<i64: 1, 128, 128>}, {transform_indices = @transform_1, window_bounds = array<i64: 1, 16, 128>}, {transform_indices = @transform_2, window_bounds = array<i64: 1, 16, 128>}, {transform_indices = @transform_3, window_bounds = array<i64: 1, 1, 16, 1>}, {transform_indices = @transform_4, window_bounds = array<i64: 1, 1, 16, 1>}]} {
    %c0 = arith.constant 0 : index
    %c0_0 = arith.constant 0 : index
    %c0_1 = arith.constant 0 : index
    %0 = vector.load %arg3[%c0, %c0_0, %c0_1] : memref<1x16x128xbf16, #tpu.memory_space<vmem>>, vector<1x16x128xbf16>
    %1 = vector.shape_cast %0 : vector<1x16x128xbf16> to vector<16x128xbf16>
    %c0_2 = arith.constant 0 : index
    %c0_3 = arith.constant 0 : index
    %c0_4 = arith.constant 0 : index
    %2 = vector.load %arg2[%c0_2, %c0_3, %c0_4] : memref<1x128x128xbf16, #tpu.memory_space<vmem>>, vector<1x128x128xbf16>
    %3 = vector.shape_cast %2 : vector<1x128x128xbf16> to vector<128x128xbf16>
    %cst = arith.constant dense<0.000000e+00> : vector<16x128xf32>
    %4 = tpu.matmul %1, %3, %cst {dimension_numbers = #tpu.dot_dimension_numbers<[1], [0], [0], [1], [0, 0, 1, 1], [], []>} : vector<16x128xbf16>, vector<128x128xbf16>, vector<16x128xf32> -> vector<16x128xf32>
    %5 = vector.shape_cast %4 : vector<16x128xf32> to vector<1x16x128xf32>
    %c0_5 = arith.constant 0 : index
    %c0_6 = arith.constant 0 : index
    %c0_7 = arith.constant 0 : index
    %6 = vector.load %arg4[%c0_5, %c0_6, %c0_7] : memref<1x16x128xf32, #tpu.memory_space<vmem>>, vector<1x16x128xf32>
    tpu.vector_store %arg4[%c0_5, %c0_6, %c0_7], %5 {strides = array<i32>} : memref<1x16x128xf32, #tpu.memory_space<vmem>>, vector<1x16x128xf32>,
    %cst_8 = arith.constant dense<0.000000e+00> : vector<16xf32>
    %7 = vector.multi_reduction <add>, %4, %cst_8 [1] : vector<16x128xf32> to vector<16xf32>
    %8 = vector.shape_cast %7 : vector<16xf32> to vector<16x1xf32>
    %9 = vector.shape_cast %8 : vector<16x1xf32> to vector<1x1x16x1xf32>
    %c0_9 = arith.constant 0 : index
    %c0_10 = arith.constant 0 : index
    %c0_11 = arith.constant 0 : index
    %c0_12 = arith.constant 0 : index
    %10 = vector.load %arg5[%c0_9, %c0_10, %c0_11, %c0_12] : memref<1x1x16x1xf32, #tpu.memory_space<vmem>>, vector<1x1x16x1xf32>
    tpu.vector_store %arg5[%c0_9, %c0_10, %c0_11, %c0_12], %9 {strides = array<i32>} : memref<1x1x16x1xf32, #tpu.memory_space<vmem>>, vector<1x1x16x1xf32>,
    %11 = arith.mulf %4, %4 : vector<16x128xf32>
    %cst_13 = arith.constant dense<0.000000e+00> : vector<16xf32>
    %12 = vector.multi_reduction <add>, %11, %cst_13 [1] : vector<16x128xf32> to vector<16xf32>
    %13 = vector.shape_cast %12 : vector<16xf32> to vector<16x1xf32>
    %14 = vector.shape_cast %13 : vector<16x1xf32> to vector<1x1x16x1xf32>
    %c0_14 = arith.constant 0 : index
    %c0_15 = arith.constant 0 : index
    %c0_16 = arith.constant 0 : index
    %c0_17 = arith.constant 0 : index
    %15 = vector.load %arg6[%c0_14, %c0_15, %c0_16, %c0_17] : memref<1x1x16x1xf32, #tpu.memory_space<vmem>>, vector<1x1x16x1xf32>
    tpu.vector_store %arg6[%c0_14, %c0_15, %c0_16, %c0_17], %14 {strides = array<i32>} : memref<1x1x16x1xf32, #tpu.memory_space<vmem>>, vector<1x1x16x1xf32>,
    return
  }
  func.func @transform_0(%arg0: i32, %arg1: i32) -> (i32, i32, i32) {
    %c0_i32 = arith.constant 0 : i32
    %c0_i32_0 = arith.constant 0 : i32
    return %arg0, %c0_i32, %arg1 : i32, i32, i32
  }
  func.func @transform_1(%arg0: i32, %arg1: i32) -> (i32, i32, i32) {
    %c0_i32 = arith.constant 0 : i32
    %c0_i32_0 = arith.constant 0 : i32
    %c0_i32_1 = arith.constant 0 : i32
    return %arg0, %c0_i32, %c0_i32_0 : i32, i32, i32
  }
  func.func @transform_2(%arg0: i32, %arg1: i32) -> (i32, i32, i32) {
    %c0_i32 = arith.constant 0 : i32
    %c0_i32_0 = arith.constant 0 : i32
    return %arg0, %c0_i32, %arg1 : i32, i32, i32
  }
  func.func @transform_3(%arg0: i32, %arg1: i32) -> (i32, i32, i32, i32) {
    %c0_i32 = arith.constant 0 : i32
    %c0_i32_0 = arith.constant 0 : i32
    %c0_i32_1 = arith.constant 0 : i32
    return %arg0, %arg1, %c0_i32, %c0_i32_0 : i32, i32, i32, i32
  }
  func.func @transform_4(%arg0: i32, %arg1: i32) -> (i32, i32, i32, i32) {
    %c0_i32 = arith.constant 0 : i32
    %c0_i32_0 = arith.constant 0 : i32
    %c0_i32_1 = arith.constant 0 : i32
    return %arg0, %arg1, %c0_i32, %c0_i32_0 : i32, i32, i32, i32
  }
}

module attributes {stable_mosaic.version = 11 : i64} {
  func.func @_affine_relu_kernel(%arg0: i32, %arg1: memref<16x256xf32, #tpu.memory_space<vmem>>, %arg2: memref<16x1xf32, #tpu.memory_space<vmem>>, %arg3: memref<16x1xf32, #tpu.memory_space<vmem>>, %arg4: memref<16x256xf32, #tpu.memory_space<vmem>>) attributes {dimension_semantics = [#tpu.dimension_semantics<parallel>], iteration_bounds = array<i64: 2>, scalar_prefetch = 0 : i64, scratch_operands = 0 : i64, tpu.core_type = #tpu.core_type<tc>, window_params = [{transform_indices = @transform_0, window_bounds = array<i64: 16, 256>}, {pipeline_mode = #tpu.pipeline_mode<synchronous>, transform_indices = @transform_1, window_bounds = array<i64: 16, 1>}, {pipeline_mode = #tpu.pipeline_mode<synchronous>, transform_indices = @transform_2, window_bounds = array<i64: 16, 1>}, {transform_indices = @transform_3, window_bounds = array<i64: 16, 256>}]} {
    %c0 = arith.constant 0 : index
    %c0_0 = arith.constant 0 : index
    %0 = vector.load %arg1[%c0, %c0_0] : memref<16x256xf32, #tpu.memory_space<vmem>>, vector<16x256xf32>
    %c0_1 = arith.constant 0 : index
    %c0_2 = arith.constant 0 : index
    %1 = vector.load %arg2[%c0_1, %c0_2] : memref<16x1xf32, #tpu.memory_space<vmem>>, vector<16x1xf32>
    %2 = vector.broadcast %1 : vector<16x1xf32> to vector<16x256xf32>
    %3 = arith.mulf %0, %2 : vector<16x256xf32>
    %c0_3 = arith.constant 0 : index
    %c0_4 = arith.constant 0 : index
    %4 = vector.load %arg3[%c0_3, %c0_4] : memref<16x1xf32, #tpu.memory_space<vmem>>, vector<16x1xf32>
    %5 = vector.broadcast %4 : vector<16x1xf32> to vector<16x256xf32>
    %6 = arith.addf %3, %5 : vector<16x256xf32>
    %cst = arith.constant 0.000000e+00 : f32
    %7 = vector.broadcast %cst : f32 to vector<16x256xf32>
    %8 = arith.maximumf %6, %7 : vector<16x256xf32>
    %c0_5 = arith.constant 0 : index
    %c0_6 = arith.constant 0 : index
    %9 = vector.load %arg4[%c0_5, %c0_6] : memref<16x256xf32, #tpu.memory_space<vmem>>, vector<16x256xf32>
    tpu.vector_store %arg4[%c0_5, %c0_6], %8 {strides = array<i32>} : memref<16x256xf32, #tpu.memory_space<vmem>>, vector<16x256xf32>,
    return
  }
  func.func @transform_0(%arg0: i32) -> (i32, i32) {
    %c0_i32 = arith.constant 0 : i32
    %c0_i32_0 = arith.constant 0 : i32
    return %c0_i32, %arg0 : i32, i32
  }
  func.func @transform_1(%arg0: i32) -> (i32, i32) {
    %c0_i32 = arith.constant 0 : i32
    %c0_i32_0 = arith.constant 0 : i32
    %c0_i32_1 = arith.constant 0 : i32
    return %c0_i32, %c0_i32_0 : i32, i32
  }
  func.func @transform_2(%arg0: i32) -> (i32, i32) {
    %c0_i32 = arith.constant 0 : i32
    %c0_i32_0 = arith.constant 0 : i32
    %c0_i32_1 = arith.constant 0 : i32
    return %c0_i32, %c0_i32_0 : i32, i32
  }
  func.func @transform_3(%arg0: i32) -> (i32, i32) {
    %c0_i32 = arith.constant 0 : i32
    %c0_i32_0 = arith.constant 0 : i32
    return %c0_i32, %arg0 : i32, i32
  }
}

module attributes {stable_mosaic.version = 11 : i64} {
  func.func @_phase_matmul_bias_tanh_kernel(%arg0: i32, %arg1: i32, %arg2: memref<1x64x256xbf16, #tpu.memory_space<vmem>>, %arg3: memref<1x3x64xbf16, #tpu.memory_space<vmem>>, %arg4: memref<3x1xf32, #tpu.memory_space<vmem>>, %arg5: memref<1x3x256xf32, #tpu.memory_space<vmem>>) attributes {dimension_semantics = [#tpu.dimension_semantics<parallel>, #tpu.dimension_semantics<parallel>], iteration_bounds = array<i64: 4, 2>, scalar_prefetch = 0 : i64, scratch_operands = 0 : i64, tpu.core_type = #tpu.core_type<tc>, window_params = [{transform_indices = @transform_0, window_bounds = array<i64: 1, 64, 256>}, {transform_indices = @transform_1, window_bounds = array<i64: 1, 3, 64>}, {pipeline_mode = #tpu.pipeline_mode<synchronous>, transform_indices = @transform_2, window_bounds = array<i64: 3, 1>}, {transform_indices = @transform_3, window_bounds = array<i64: 1, 3, 256>}]} {
    %c0 = arith.constant 0 : index
    %c0_0 = arith.constant 0 : index
    %c0_1 = arith.constant 0 : index
    %0 = vector.load %arg3[%c0, %c0_0, %c0_1] : memref<1x3x64xbf16, #tpu.memory_space<vmem>>, vector<1x3x64xbf16>
    %1 = vector.shape_cast %0 : vector<1x3x64xbf16> to vector<3x64xbf16>
    %c0_2 = arith.constant 0 : index
    %c0_3 = arith.constant 0 : index
    %c0_4 = arith.constant 0 : index
    %2 = vector.load %arg2[%c0_2, %c0_3, %c0_4] : memref<1x64x256xbf16, #tpu.memory_space<vmem>>, vector<1x64x256xbf16>
    %3 = vector.shape_cast %2 : vector<1x64x256xbf16> to vector<64x256xbf16>
    %cst = arith.constant dense<0.000000e+00> : vector<3x256xf32>
    %4 = tpu.matmul %1, %3, %cst {dimension_numbers = #tpu.dot_dimension_numbers<[1], [0], [0], [1], [0, 0, 1, 1], [], []>} : vector<3x64xbf16>, vector<64x256xbf16>, vector<3x256xf32> -> vector<3x256xf32>
    %c0_5 = arith.constant 0 : index
    %c0_6 = arith.constant 0 : index
    %5 = vector.load %arg4[%c0_5, %c0_6] : memref<3x1xf32, #tpu.memory_space<vmem>>, vector<3x1xf32>
    %6 = vector.broadcast %5 : vector<3x1xf32> to vector<3x256xf32>
    %7 = arith.addf %4, %6 : vector<3x256xf32>
    %8 = math.tanh %7 : vector<3x256xf32>
    %9 = vector.shape_cast %8 : vector<3x256xf32> to vector<1x3x256xf32>
    %c0_7 = arith.constant 0 : index
    %c0_8 = arith.constant 0 : index
    %c0_9 = arith.constant 0 : index
    %10 = vector.load %arg5[%c0_7, %c0_8, %c0_9] : memref<1x3x256xf32, #tpu.memory_space<vmem>>, vector<1x3x256xf32>
    tpu.vector_store %arg5[%c0_7, %c0_8, %c0_9], %9 {strides = array<i32>} : memref<1x3x256xf32, #tpu.memory_space<vmem>>, vector<1x3x256xf32>,
    return
  }
  func.func @transform_0(%arg0: i32, %arg1: i32) -> (i32, i32, i32) {
    %c0_i32 = arith.constant 0 : i32
    %c0_i32_0 = arith.constant 0 : i32
    return %arg0, %c0_i32, %arg1 : i32, i32, i32
  }
  func.func @transform_1(%arg0: i32, %arg1: i32) -> (i32, i32, i32) {
    %c0_i32 = arith.constant 0 : i32
    %c0_i32_0 = arith.constant 0 : i32
    %c0_i32_1 = arith.constant 0 : i32
    return %arg0, %c0_i32, %c0_i32_0 : i32, i32, i32
  }
  func.func @transform_2(%arg0: i32, %arg1: i32) -> (i32, i32) {
    %c0_i32 = arith.constant 0 : i32
    %c0_i32_0 = arith.constant 0 : i32
    %c0_i32_1 = arith.constant 0 : i32
    return %c0_i32, %c0_i32_0 : i32, i32
  }
  func.func @transform_3(%arg0: i32, %arg1: i32) -> (i32, i32, i32) {
    %c0_i32 = arith.constant 0 : i32
    %c0_i32_0 = arith.constant 0 : i32
    return %arg0, %c0_i32, %arg1 : i32, i32, i32
  }
}

</mosaic_0001>

<bundles_post_ra>
// kernel: generator_forward.7
= control target key start
LH: loop header
LB: loop body
LE: loop exit
PB: predicated region body
PF: predicated region fallthrough
CT: control target
= control target key end

     0   :  { %s833_s15 = smov 0   ;;  %s835_s16 = smov 0   ;;  %s920_s0 = inlined_call_operand.vmem [shape: bf16[16,32,2], index: 0, kind: input, shape index: {}]   ;;  %s921_s1 = inlined_call_operand.vmem [shape: bf16[16,64,32], index: 1, kind: input, shape index: {}]   ;;  %s922_s2 = inlined_call_operand.vmem [shape: f32[16,64,2], index: 2, kind: output, shape index: {0}]   ;;  %s923_s3 = inlined_call_operand.vmem [shape: f32[16,1,64,1], index: 3, kind: output, shape index: {1}]   ;;  %s924_s4 = inlined_call_operand.vmem [shape: f32[16,1,64,1], index: 4, kind: output, shape index: {2}]  }
   0x1   :  { %s837_s17 = smov 0  }
   0x2 LB: > { %s27_s18 = sadd.s32 1, %s802_s16  ;;  %p704_p0 = scmp.ge.s32.totalorder %s806_s17, 1  ;;  %s806_s17 = sphi %s837_s17, %s15_s17   ;;  %s802_s16 = sphi %s835_s16, %s926_s16   ;;  %s798_s15 = sphi %s833_s15, %s925_s15  }
   0x3   : > { %p29_p1 = scmp.ge.s32.totalorder %s27_s18, 16  ;;  %p200_p2 = scmp.lt.s32.totalorder %s806_s17, 17 }
   0x5   : > { %s928_s18 = smov (%p29_p1, %s27_s18), 0  ;;  %p201_p3 = pnand %p704_p0, %p200_p2 }
   0x6   : > { %p255_p4 = scmp.lt.s32.totalorder (!%p201_p3), %s798_s15, 15  ;;  %vm339_vm0 = vcmask (!%p201_p3), 261120   ;;  %vm417_vm1 = vcmask (!%p201_p3), 15360   ;;  %vm450_vm2 = vcmask (!%p201_p3), 7168  }
   0x7   : > { %204 = sbr.rel (%p201_p3) target bundleno = 410 (0x19a), region = 28 }
   0xe   : > { %s930_s15 = smov (!%p255_p4, %s798_s15), 15 }
   0xf   : > { %s727_s19 = sshll.u32 %s930_s15, 4  ;;  %s728_s20 = sshll.u32 %s930_s15, 5 }
  0x10   : > { %s262_s23 = scalar_lea.vmem %s920_s0, %s727_s19  ;;  %s267_s26 = scalar_lea.vmem %s921_s1, %s728_s20 }
  0x11   : > { %v778_v0 = vld [vmem:[%s262_s23] sm:$0xff]   ;;  %v779_v1 = vld [vmem:[%s262_s23 + $0x8] sm:$0xff]   ;;  %v781_v3 = vld [vmem:[%s267_s26 + $0x10] sm:$0xff]   ;;  %s857_s27 = sshll.u32 %s930_s15, 6 }
  0x12   : > { %738 = vmatprep.subr.bf16.mxu0 %v778_v0  ;;  %750 = vmatprep.subr.bf16.mxu1 %v778_v0  ;;  %v780_v2 = vld [vmem:[%s267_s26] sm:$0xff]   ;;  %v782_v4 = vld [vmem:[%s267_s26 + $0x8] sm:$0xff]   ;;  %v783_v5 = vld [vmem:[%s267_s26 + $0x18] sm:$0xff]   ;;  %s275_s30 = scalar_lea.vmem %s922_s2, %s857_s27  ;;  %s284_s7 = scalar_lea.vmem %s923_s3, %s857_s27 }
  0x13   : > { %739 = vmatpush3.bf16.msra.mxu0 %v778_v0  ;;  %752 = vmatpush3.bf16.msra.mxu1 %v778_v0  ;;  %s293_s10 = scalar_lea.vmem %s924_s4, %s857_s27 }
  0x14   : > { %740 = vmatprep.subr.bf16.mxu0 %v779_v1  ;;  %751 = vmatprep.subr.bf16.mxu1 %v779_v1 }
  0x15   : > { %742 = vmatprep.mubr.msk.bf16.mxu0 %vm339_vm0, %v780_v2  ;;  %746 = vmatprep.mubr.msk.bf16.mxu1 %vm339_vm0, %v781_v3 }
  0x17   : > { %741 = vmatpush3.bf16.msra.mxu0 %v779_v1  ;;  %753 = vmatpush3.bf16.msra.mxu1 %v779_v1 }
  0x1a   : > { %743 = vmatmul.mubr.msk.bf16.vlgmr.msra.gmra.mrb[0].mxu0 %vm339_vm0, %v782_v4  ;;  %747 = vmatmul.mubr.msk.bf16.vlgmr.msra.gmra.mrb[0].mxu1 %vm339_vm0, %v783_v5 }
  0xed   : > { %v744_v6 = vpop.f32.mrb[0].mxu0  ;;  %v748_v7 = vpop.f32.mrb[0].mxu1 }
  0xee   : > { %420 = vst.msk [vmem:[%s275_s30 + $0x10] sm:$0xff] %vm417_vm1, %v744_v6  ;;  %424 = vst.msk [vmem:[%s275_s30 + $0x30] sm:$0xff] %vm417_vm1, %v748_v7  ;;  %v386_v8 = vpop.f32.mrb[1].mxu0  ;;  %v402_v9 = vpop.f32.mrb[1].mxu1  ;;  %v444_v10 = vsel %vm417_vm1, %v748_v7, 0.0  ;;  %v432_v11 = vsel %vm417_vm1, %v744_v6, 0.0  ;;  %v461_v20 = vmul.f32 %v744_v6, %v744_v6  ;;  %v465_v35 = vmul.f32 %v748_v7, %v748_v7 }
  0xef   : > { %418 = vst.msk [vmem:[%s275_s30] sm:$0xff] %vm417_vm1, %v386_v8  ;;  %422 = vst.msk [vmem:[%s275_s30 + $0x20] sm:$0xff] %vm417_vm1, %v402_v9  ;;  %445 = vadd.xlane.f32.xlu0 %v444_v10  ;;  %v749_v12 = vpop.f32.mrb[2].mxu1  ;;  %433 = vadd.xlane.f32.xlu1 %v432_v11  ;;  %v745_v13 = vpop.f32.mrb[2].mxu0  ;;  %v426_v16 = vsel %vm417_vm1, %v386_v8, 0.0  ;;  %v438_v18 = vsel %vm417_vm1, %v402_v9, 0.0  ;;  %v459_v27 = vmul.f32 %v386_v8, %v386_v8 }
  0xf0   : > { %425 = vst.msk [vmem:[%s275_s30 + $0x38] sm:$0xff] %vm417_vm1, %v749_v12  ;;  %421 = vst.msk [vmem:[%s275_s30 + $0x18] sm:$0xff] %vm417_vm1, %v745_v13  ;;  %v389_v14 = vpop.f32.mrb[3].mxu0  ;;  %v405_v15 = vpop.f32.mrb[3].mxu1  ;;  %v435_v17 = vsel %vm417_vm1, %v745_v13, 0.0  ;;  %v447_v19 = vsel %vm417_vm1, %v749_v12, 0.0  ;;  %v462_v23 = vmul.f32 %v745_v13, %v745_v13  ;;  %v463_v31 = vmul.f32 %v402_v9, %v402_v9 }
  0xf1   : > { %419 = vst.msk [vmem:[%s275_s30 + $0x8] sm:$0xff] %vm417_vm1, %v389_v14  ;;  %423 = vst.msk [vmem:[%s275_s30 + $0x28] sm:$0xff] %vm417_vm1, %v405_v15  ;;  %v473_v21 = vsel %vm417_vm1, %v461_v20, 0.0  ;;  %v441_v22 = vsel %vm417_vm1, %v405_v15, 0.0  ;;  %v460_v24 = vmul.f32 %v389_v14, %v389_v14  ;;  %v429_v26 = vsel %vm417_vm1, %v389_v14, 0.0 }
  0xf2   : > { %v476_v25 = vsel %vm417_vm1, %v462_v23, 0.0  ;;  %v464_v28 = vmul.f32 %v405_v15, %v405_v15  ;;  %v467_v30 = vsel %vm417_vm1, %v459_v27, 0.0  ;;  %v479_v33 = vsel %vm417_vm1, %v463_v31, 0.0 }
  0xf3   : > { %427 = vadd.xlane.f32.xlu0 %v426_v16  ;;  %436 = vadd.xlane.f32.xlu1 %v435_v17  ;;  %v470_v29 = vsel %vm417_vm1, %v460_v24, 0.0  ;;  %v466_v34 = vmul.f32 %v749_v12, %v749_v12  ;;  %v485_v37 = vsel %vm417_vm1, %v465_v35, 0.0 }
  0xf4   : > { %v482_v32 = vsel %vm417_vm1, %v464_v28, 0.0 }
  0xf5   : > { %v488_v36 = vsel %vm417_vm1, %v466_v34, 0.0 }
  0xf7   : > { %439 = vadd.xlane.f32.xlu0 %v438_v18  ;;  %448 = vadd.xlane.f32.xlu1 %v447_v19 }
  0xfb   : > { %474 = vadd.xlane.f32.xlu0 %v473_v21  ;;  %442 = vadd.xlane.f32.xlu1 %v441_v22 }
  0xff   : > { %477 = vadd.xlane.f32.xlu1 %v476_v25  ;;  %430 = vadd.xlane.f32.xlu0 %v429_v26 }
 0x103   : > { %471 = vadd.xlane.f32.xlu1 %v470_v29  ;;  %468 = vadd.xlane.f32.xlu0 %v467_v30 }
 0x107   : > { %483 = vadd.xlane.f32.xlu1 %v482_v32  ;;  %480 = vadd.xlane.f32.xlu0 %v479_v33 }
 0x10b   : > { %489 = vadd.xlane.f32.xlu1 %v488_v36  ;;  %486 = vadd.xlane.f32.xlu0 %v485_v37 }
 0x17c   : > { %v446_v38 = vpop.xlane.xlu0 %445  ;;  %v434_v39 = vpop.xlane.xlu1 %433 }
 0x17d   : > { %457 = vst.msk [vmem:[%s284_s7 + $0x30] sm:$0xff] %vm450_vm2, %v446_v38  ;;  %453 = vst.msk [vmem:[%s284_s7 + $0x10] sm:$0xff] %vm450_vm2, %v434_v39 }
 0x180   : > { %v428_v40 = vpop.xlane.xlu0 %427  ;;  %v437_v41 = vpop.xlane.xlu1 %436 }
 0x181   : > { %451 = vst.msk [vmem:[%s284_s7] sm:$0xff] %vm450_vm2, %v428_v40  ;;  %454 = vst.msk [vmem:[%s284_s7 + $0x18] sm:$0xff] %vm450_vm2, %v437_v41 }
 0x184   : > { %v440_v42 = vpop.xlane.xlu0 %439  ;;  %v449_v43 = vpop.xlane.xlu1 %448 }
 0x185   : > { %455 = vst.msk [vmem:[%s284_s7 + $0x20] sm:$0xff] %vm450_vm2, %v440_v42  ;;  %458 = vst.msk [vmem:[%s284_s7 + $0x38] sm:$0xff] %vm450_vm2, %v449_v43 }
 0x188   : > { %v475_v44 = vpop.xlane.xlu0 %474  ;;  %v443_v45 = vpop.xlane.xlu1 %442 }
 0x189   : > { %493 = vst.msk [vmem:[%s293_s10 + $0x10] sm:$0xff] %vm450_vm2, %v475_v44  ;;  %456 = vst.msk [vmem:[%s284_s7 + $0x28] sm:$0xff] %vm450_vm2, %v443_v45 }
 0x18c   : > { %v478_v46 = vpop.xlane.xlu1 %477  ;;  %v431_v47 = vpop.xlane.xlu0 %430 }
 0x18d   : > { %494 = vst.msk [vmem:[%s293_s10 + $0x18] sm:$0xff] %vm450_vm2, %v478_v46  ;;  %452 = vst.msk [vmem:[%s284_s7 + $0x8] sm:$0xff] %vm450_vm2, %v431_v47 }
 0x190   : > { %v472_v48 = vpop.xlane.xlu1 %471  ;;  %v469_v49 = vpop.xlane.xlu0 %468 }
 0x191   : > { %492 = vst.msk [vmem:[%s293_s10 + $0x8] sm:$0xff] %vm450_vm2, %v472_v48  ;;  %491 = vst.msk [vmem:[%s293_s10] sm:$0xff] %vm450_vm2, %v469_v49 }
 0x194   : > { %v484_v50 = vpop.xlane.xlu1 %483  ;;  %v481_v51 = vpop.xlane.xlu0 %480 }
 0x195   : > { %496 = vst.msk [vmem:[%s293_s10 + $0x28] sm:$0xff] %vm450_vm2, %v484_v50  ;;  %495 = vst.msk [vmem:[%s293_s10 + $0x20] sm:$0xff] %vm450_vm2, %v481_v51 }
 0x198   : > { %v490_v52 = vpop.xlane.xlu1 %489  ;;  %v487_v53 = vpop.xlane.xlu0 %486 }
 0x199   : > { %498 = vst.msk [vmem:[%s293_s10 + $0x38] sm:$0xff] %vm450_vm2, %v490_v52  ;;  %497 = vst.msk [vmem:[%s293_s10 + $0x30] sm:$0xff] %vm450_vm2, %v487_v53 }
 0x19a PF: > { %s15_s17 = sadd.s32 1, %s806_s17   ;;  %s925_s15 = smov %s802_s16 }
 0x19b   : > { %p12_p5 = scmp.ge.s32.totalorder %s15_s17, 18   ;;  %s926_s16 = smov %s928_s18 }
 0x19d   :  { %14 = sbr.rel (!%p12_p5) target bundleno = 2 (0x2), region = 85 }

// kernel: generator_forward.8
= control target key start
LH: loop header
LB: loop body
LE: loop exit
PB: predicated region body
PF: predicated region fallthrough
CT: control target
= control target key end

     0   :  { %v158_v0 = vmov 0   ;;  %vm142_vm0 = vcmask 261120   ;;  %s283_s1 = inlined_call_operand.vmem [shape: f32[64,1], index: 1, kind: input, shape index: {}]   ;;  %s284_s2 = inlined_call_operand.vmem [shape: f32[64,1], index: 2, kind: input, shape index: {}]   ;;  %s285_s0 = inlined_call_operand.vmem [shape: f32[64,32], index: 0, kind: input, shape index: {}]   ;;  %s286_s3 = inlined_call_operand.vmem [shape: f32[64,32], index: 3, kind: output, shape index: {}]  }
   0x1   :  { %157 = vset.pattern.permute.xlu1 %v158_v0  ;;  %156 = vset.pattern.permute.xlu0 %v158_v0  ;;  %v24_v1 = vld [vmem:[%s283_s1 + $0x10] sm:$0xff]  ;;  %v22_v2 = vld [vmem:[%s283_s1] sm:$0xff]  ;;  %v25_v3 = vld [vmem:[%s283_s1 + $0x18] sm:$0xff] }
   0x2   :  { %42 = vperm.xlu1 %157, %v24_v1   ;;  %32 = vperm.xlu0 %156, %v22_v2   ;;  %v23_v4 = vld [vmem:[%s283_s1 + $0x8] sm:$0xff]  ;;  %v26_v6 = vld [vmem:[%s283_s1 + $0x20] sm:$0xff]  ;;  %v29_v7 = vld [vmem:[%s283_s1 + $0x38] sm:$0xff] }
   0x3   :  { %v27_v5 = vld [vmem:[%s283_s1 + $0x28] sm:$0xff]  ;;  %v28_v8 = vld [vmem:[%s283_s1 + $0x30] sm:$0xff]  ;;  %v78_v10 = vld [vmem:[%s284_s2] sm:$0xff] }
   0x4   :  { %v79_v9 = vld [vmem:[%s284_s2 + $0x8] sm:$0xff]  ;;  %v81_v11 = vld [vmem:[%s284_s2 + $0x18] sm:$0xff]  ;;  %v80_v12 = vld [vmem:[%s284_s2 + $0x10] sm:$0xff] }
   0x5   :  { %v83_v13 = vld [vmem:[%s284_s2 + $0x28] sm:$0xff]  ;;  %v82_v14 = vld [vmem:[%s284_s2 + $0x20] sm:$0xff]  ;;  %v85_v15 = vld [vmem:[%s284_s2 + $0x38] sm:$0xff] }
   0x6   :  { %47 = vperm.xlu1 %157, %v25_v3   ;;  %37 = vperm.xlu0 %156, %v23_v4   ;;  %v84_v16 = vld [vmem:[%s284_s2 + $0x30] sm:$0xff]  ;;  %v14_v23 = vld [vmem:[%s285_s0] sm:$0xff]  ;;  %v15_v24 = vld [vmem:[%s285_s0 + $0x8] sm:$0xff] }
   0x7   :  { %v16_v29 = vld [vmem:[%s285_s0 + $0x10] sm:$0xff]  ;;  %v17_v30 = vld [vmem:[%s285_s0 + $0x18] sm:$0xff]  ;;  %v19_v39 = vld [vmem:[%s285_s0 + $0x28] sm:$0xff] }
   0x8   :  { %v18_v40 = vld [vmem:[%s285_s0 + $0x20] sm:$0xff]  ;;  %v21_v49 = vld [vmem:[%s285_s0 + $0x38] sm:$0xff]  ;;  %v20_v50 = vld [vmem:[%s285_s0 + $0x30] sm:$0xff] }
   0xa   :  { %57 = vperm.xlu1 %157, %v27_v5   ;;  %52 = vperm.xlu0 %156, %v26_v6  }
   0xe   :  { %67 = vperm.xlu1 %157, %v29_v7   ;;  %62 = vperm.xlu0 %156, %v28_v8  }
  0x12   :  { %93 = vperm.xlu1 %157, %v79_v9   ;;  %88 = vperm.xlu0 %156, %v78_v10  }
  0x16   :  { %103 = vperm.xlu1 %157, %v81_v11   ;;  %98 = vperm.xlu0 %156, %v80_v12  }
  0x1a   :  { %113 = vperm.xlu1 %157, %v83_v13   ;;  %108 = vperm.xlu0 %156, %v82_v14  }
  0x1e   :  { %123 = vperm.xlu1 %157, %v85_v15   ;;  %118 = vperm.xlu0 %156, %v84_v16  }
  0x81   :  { %v43_v17 = vpop.permute.xlu1 %42  ;;  %v33_v18 = vpop.permute.xlu0 %32 }
  0x82   :  { %v70_v27 = vmul.f32 %v33_v18, %v14_v23  ;;  %v72_v35 = vmul.f32 %v43_v17, %v16_v29 }
  0x85   :  { %v48_v19 = vpop.permute.xlu1 %47  ;;  %v38_v20 = vpop.permute.xlu0 %37 }
  0x86   :  { %v71_v28 = vmul.f32 %v38_v20, %v15_v24  ;;  %v73_v36 = vmul.f32 %v48_v19, %v17_v30 }
  0x89   :  { %v58_v21 = vpop.permute.xlu1 %57  ;;  %v53_v22 = vpop.permute.xlu0 %52 }
  0x8a   :  { %v75_v45 = vmul.f32 %v58_v21, %v19_v39  ;;  %v74_v46 = vmul.f32 %v53_v22, %v18_v40 }
  0x8d   :  { %v68_v25 = vpop.permute.xlu1 %67  ;;  %v63_v26 = vpop.permute.xlu0 %62 }
  0x8e   :  { %v77_v55 = vmul.f32 %v68_v25, %v21_v49  ;;  %v76_v56 = vmul.f32 %v63_v26, %v20_v50 }
  0x91   :  { %v94_v31 = vpop.permute.xlu1 %93  ;;  %v89_v32 = vpop.permute.xlu0 %88 }
  0x92   :  { %v127_v33 = vadd.f32 %v94_v31, %v71_v28  ;;  %v126_v34 = vadd.f32 %v89_v32, %v70_v27 }
  0x94   :  { %v135_v37 = vmax.f32 %v127_v33, 0.0  ;;  %v134_v38 = vmax.f32 %v126_v34, 0.0 }
  0x95   :  { %v104_v41 = vpop.permute.xlu1 %103  ;;  %v99_v42 = vpop.permute.xlu0 %98 }
  0x96   :  { %144 = vst.msk [vmem:[%s286_s3 + $0x8] sm:$0xff] %vm142_vm0, %v135_v37  ;;  %143 = vst.msk [vmem:[%s286_s3] sm:$0xff] %vm142_vm0, %v134_v38  ;;  %v129_v43 = vadd.f32 %v104_v41, %v73_v36  ;;  %v128_v44 = vadd.f32 %v99_v42, %v72_v35 }
  0x98   :  { %v137_v47 = vmax.f32 %v129_v43, 0.0  ;;  %v136_v48 = vmax.f32 %v128_v44, 0.0 }
  0x99   :  { %v114_v51 = vpop.permute.xlu1 %113  ;;  %v109_v52 = vpop.permute.xlu0 %108 }
  0x9a   :  { %146 = vst.msk [vmem:[%s286_s3 + $0x18] sm:$0xff] %vm142_vm0, %v137_v47  ;;  %145 = vst.msk [vmem:[%s286_s3 + $0x10] sm:$0xff] %vm142_vm0, %v136_v48  ;;  %v131_v53 = vadd.f32 %v114_v51, %v75_v45  ;;  %v130_v54 = vadd.f32 %v109_v52, %v74_v46 }
  0x9c   :  { %v139_v57 = vmax.f32 %v131_v53, 0.0  ;;  %v138_v58 = vmax.f32 %v130_v54, 0.0 }
  0x9d   :  { %v124_v59 = vpop.permute.xlu1 %123  ;;  %v119_v60 = vpop.permute.xlu0 %118 }
  0x9e   :  { %148 = vst.msk [vmem:[%s286_s3 + $0x28] sm:$0xff] %vm142_vm0, %v139_v57  ;;  %147 = vst.msk [vmem:[%s286_s3 + $0x20] sm:$0xff] %vm142_vm0, %v138_v58  ;;  %v133_v61 = vadd.f32 %v124_v59, %v77_v55  ;;  %v132_v62 = vadd.f32 %v119_v60, %v76_v56 }
  0xa0   :  { %v141_v63 = vmax.f32 %v133_v61, 0.0  ;;  %v140_v0 = vmax.f32 %v132_v62, 0.0 }
  0xa2   :  { %150 = vst.msk [vmem:[%s286_s3 + $0x38] sm:$0xff] %vm142_vm0, %v141_v63  ;;  %149 = vst.msk [vmem:[%s286_s3 + $0x30] sm:$0xff] %vm142_vm0, %v140_v0 }

// kernel: generator_forward.9
= control target key start
LH: loop header
LB: loop body
LE: loop exit
PB: predicated region body
PF: predicated region fallthrough
CT: control target
= control target key end

     0   :  { %s920_s15 = smov 0   ;;  %s922_s16 = smov 0   ;;  %s1006_s0 = inlined_call_operand.vmem [shape: bf16[4,256,32], index: 0, kind: input, shape index: {}]   ;;  %s1007_s1 = inlined_call_operand.vmem [shape: bf16[4,32,256], index: 1, kind: input, shape index: {}]   ;;  %s1008_s2 = inlined_call_operand.vmem [shape: f32[4,32,32], index: 2, kind: output, shape index: {0}]   ;;  %s1009_s3 = inlined_call_operand.vmem [shape: f32[4,1,32,1], index: 3, kind: output, shape index: {1}]   ;;  %s1010_s4 = inlined_call_operand.vmem [shape: f32[4,1,32,1], index: 4, kind: output, shape index: {2}]  }
   0x1   :  { %s924_s17 = smov 0  }
   0x2 LB: > { %s27_s18 = sadd.s32 1, %s889_s16  ;;  %p743_p0 = scmp.ge.s32.totalorder %s893_s17, 1  ;;  %s893_s17 = sphi %s924_s17, %s15_s17   ;;  %s889_s16 = sphi %s922_s16, %s1012_s16   ;;  %s885_s15 = sphi %s920_s15, %s1011_s15  }
   0x3   : > { %p29_p1 = scmp.ge.s32.totalorder %s27_s18, 4  ;;  %p200_p2 = scmp.lt.s32.totalorder %s893_s17, 5 }
   0x5   : > { %s1014_s18 = smov (%p29_p1, %s27_s18), 0  ;;  %p201_p3 = pnand %p743_p0, %p200_p2 }
   0x6   : > { %p255_p4 = scmp.lt.s32.totalorder (!%p201_p3), %s885_s15, 3  ;;  %vm496_vm0 = vcmask (!%p201_p3), 261120   ;;  %vm513_vm1 = vcmask (!%p201_p3), 7168  }
   0x7   : > { %204 = sbr.rel (%p201_p3) target bundleno = 421 (0x1a5), region = 28 }
   0xe   : > { %s1016_s15 = smov (!%p255_p4, %s885_s15), 3 }
   0xf   : > { %s776_s19 = sshll.u32 %s1016_s15, 7  ;;  %s951_s23 = sshll.u32 %s1016_s15, 5 }
  0x10   : > { %s941_s22 = scalar_lea.vmem %s1006_s0, %s776_s19  ;;  %s267_s26 = scalar_lea.vmem %s1007_s1, %s951_s23 }
  0x11   : > { %v849_v0 = vld [vmem:[%s941_s22 + $0x40] sm:$0xff]   ;;  %v851_v2 = vld [vmem:[%s941_s22 + $0x48] sm:$0xff]   ;;  %v853_v4 = vld [vmem:[%s941_s22 + $0x50] sm:$0xff]   ;;  %s275_s29 = scalar_lea.vmem %s1008_s2, %s951_s23  ;;  %s284_s6 = scalar_lea.vmem %s1009_s3, %s951_s23 }
  0x12   : > { %v850_v1 = vld [vmem:[%s941_s22] sm:$0xff]   ;;  %781 = vmatprep.subr.bf16.mxu0 %v849_v0  ;;  %809 = vmatprep.subr.bf16.mxu1 %v849_v0  ;;  %v852_v3 = vld [vmem:[%s941_s22 + $0x8] sm:$0xff]   ;;  %v854_v5 = vld [vmem:[%s941_s22 + $0x10] sm:$0xff]   ;;  %s293_s9 = scalar_lea.vmem %s1010_s4, %s951_s23 }
  0x13   : > { %782 = vmatpush3.bf16.msra.mxu0 %v850_v1  ;;  %817 = vmatpush3.bf16.msra.mxu1 %v850_v1  ;;  %v855_v6 = vld [vmem:[%s941_s22 + $0x58] sm:$0xff]   ;;  %v857_v8 = vld [vmem:[%s941_s22 + $0x60] sm:$0xff]   ;;  %v859_v10 = vld [vmem:[%s941_s22 + $0x68] sm:$0xff]  }
  0x14   : > { %783 = vmatprep.subr.bf16.mxu0 %v851_v2  ;;  %810 = vmatprep.subr.bf16.mxu1 %v851_v2  ;;  %v856_v7 = vld [vmem:[%s941_s22 + $0x18] sm:$0xff]   ;;  %v858_v9 = vld [vmem:[%s941_s22 + $0x20] sm:$0xff]   ;;  %v860_v13 = vld [vmem:[%s941_s22 + $0x28] sm:$0xff]  }
  0x15   : > { %v867_v11 = vld [vmem:[%s267_s26 + $0x4] ss:$8 sps:$4 sm:$0xff]   ;;  %v870_v12 = vld [vmem:[%s267_s26 + $0x14] ss:$8 sps:$4 sm:$0xff]   ;;  %v865_v18 = vld [vmem:[%s267_s26] ss:$8 sps:$4 sm:$0xff]  }
  0x16   : > { %v861_v14 = vld [vmem:[%s941_s22 + $0x70] sm:$0xff]   ;;  %479 = vmatprep.mubr.bf16.mxu0 %v867_v11  ;;  %487 = vmatprep.mubr.bf16.mxu1 %v870_v12  ;;  %v863_v16 = vld [vmem:[%s941_s22 + $0x78] sm:$0xff]  }
  0x17   : > { %784 = vmatpush3.bf16.msra.mxu0 %v852_v3  ;;  %818 = vmatpush3.bf16.msra.mxu1 %v852_v3  ;;  %v862_v15 = vld [vmem:[%s941_s22 + $0x30] sm:$0xff]   ;;  %v864_v17 = vld [vmem:[%s941_s22 + $0x38] sm:$0xff]  }
  0x18   : > { %785 = vmatprep.subr.bf16.mxu0 %v853_v4  ;;  %811 = vmatprep.subr.bf16.mxu1 %v853_v4  ;;  %v868_v19 = vld [vmem:[%s267_s26 + $0x10] ss:$8 sps:$4 sm:$0xff]  }
  0x1b   : > { %786 = vmatpush3.bf16.msra.mxu0 %v854_v5  ;;  %819 = vmatpush3.bf16.msra.mxu1 %v854_v5 }
  0x1c   : > { %787 = vmatprep.subr.bf16.mxu0 %v855_v6  ;;  %812 = vmatprep.subr.bf16.mxu1 %v855_v6 }
  0x1f   : > { %788 = vmatpush3.bf16.msra.mxu0 %v856_v7  ;;  %820 = vmatpush3.bf16.msra.mxu1 %v856_v7 }
  0x20   : > { %789 = vmatprep.subr.bf16.mxu0 %v857_v8  ;;  %813 = vmatprep.subr.bf16.mxu1 %v857_v8 }
  0x23   : > { %790 = vmatpush3.bf16.msra.mxu0 %v858_v9  ;;  %821 = vmatpush3.bf16.msra.mxu1 %v858_v9 }
  0x24   : > { %791 = vmatprep.subr.bf16.mxu0 %v859_v10  ;;  %814 = vmatprep.subr.bf16.mxu1 %v859_v10 }
  0x27   : > { %792 = vmatpush3.bf16.msra.mxu0 %v860_v13  ;;  %822 = vmatpush3.bf16.msra.mxu1 %v860_v13 }
  0x28   : > { %793 = vmatprep.subr.bf16.mxu0 %v861_v14  ;;  %815 = vmatprep.subr.bf16.mxu1 %v861_v14 }
  0x2b   : > { %794 = vmatpush3.bf16.msra.mxu0 %v862_v15  ;;  %823 = vmatpush3.bf16.msra.mxu1 %v862_v15 }
  0x2c   : > { %795 = vmatprep.subr.bf16.mxu0 %v863_v16  ;;  %816 = vmatprep.subr.bf16.mxu1 %v863_v16 }
  0x2f   : > { %796 = vmatpush3.bf16.msra.mxu0 %v864_v17  ;;  %824 = vmatpush3.bf16.msra.mxu1 %v864_v17 }
  0x32   : > { %480 = vmatmul.mubr.bf16.vlgmr.msra.gmra.mrb[0].mxu0 %v865_v18  ;;  %488 = vmatmul.mubr.bf16.vlgmr.msra.gmra.mrb[0].mxu1 %v868_v19 }
 0x105   : > { %v797_v20 = vpop.f32.mrb[0].mxu0  ;;  %v803_v21 = vpop.f32.mrb[0].mxu1 }
 0x106   : > { %v798_v22 = vpop.f32.mrb[1].mxu0  ;;  %v804_v23 = vpop.f32.mrb[1].mxu1 }
 0x107   : > { %v799_v24 = vadd.f32 %v798_v22, %v797_v20  ;;  %v805_v25 = vadd.f32 %v804_v23, %v803_v21  ;;  %v800_v26 = vpop.f32.mrb[2].mxu0  ;;  %v806_v27 = vpop.f32.mrb[2].mxu1 }
 0x108   : > { %v801_v28 = vpop.f32.mrb[3].mxu0  ;;  %v807_v29 = vpop.f32.mrb[3].mxu1 }
 0x109   : > { %497 = vst.msk [vmem:[%s275_s29] sm:$0xff] %vm496_vm0, %v799_v24  ;;  %499 = vst.msk [vmem:[%s275_s29 + $0x10] sm:$0xff] %vm496_vm0, %v805_v25  ;;  %v802_v30 = vadd.f32 %v801_v28, %v800_v26  ;;  %v808_v31 = vadd.f32 %v807_v29, %v806_v27  ;;  %v507_v32 = vsel %vm496_vm0, %v805_v25, 0.0  ;;  %v501_v33 = vsel %vm496_vm0, %v799_v24, 0.0 }
 0x10a   : > { %508 = vadd.xlane.f32.xlu1 %v507_v32  ;;  %502 = vadd.xlane.f32.xlu0 %v501_v33  ;;  %v518_v37 = vmul.f32 %v799_v24, %v799_v24  ;;  %v520_v41 = vmul.f32 %v805_v25, %v805_v25 }
 0x10b   : > { %498 = vst.msk [vmem:[%s275_s29 + $0x8] sm:$0xff] %vm496_vm0, %v802_v30  ;;  %500 = vst.msk [vmem:[%s275_s29 + $0x18] sm:$0xff] %vm496_vm0, %v808_v31  ;;  %v510_v34 = vsel %vm496_vm0, %v808_v31, 0.0  ;;  %v504_v35 = vsel %vm496_vm0, %v802_v30, 0.0  ;;  %v519_v36 = vmul.f32 %v802_v30, %v802_v30  ;;  %v521_v40 = vmul.f32 %v808_v31, %v808_v31 }
 0x10c   : > { %v522_v39 = vsel %vm496_vm0, %v518_v37, 0.0  ;;  %v528_v43 = vsel %vm496_vm0, %v520_v41, 0.0 }
 0x10d   : > { %v525_v38 = vsel %vm496_vm0, %v519_v36, 0.0  ;;  %v531_v42 = vsel %vm496_vm0, %v521_v40, 0.0 }
 0x10e   : > { %511 = vadd.xlane.f32.xlu1 %v510_v34  ;;  %505 = vadd.xlane.f32.xlu0 %v504_v35 }
 0x112   : > { %526 = vadd.xlane.f32.xlu1 %v525_v38  ;;  %523 = vadd.xlane.f32.xlu0 %v522_v39 }
 0x116   : > { %532 = vadd.xlane.f32.xlu1 %v531_v42  ;;  %529 = vadd.xlane.f32.xlu0 %v528_v43 }
 0x197   : > { %v509_v44 = vpop.xlane.xlu1 %508  ;;  %v503_v45 = vpop.xlane.xlu0 %502 }
 0x198   : > { %516 = vst.msk [vmem:[%s284_s6 + $0x10] sm:$0xff] %vm513_vm1, %v509_v44  ;;  %514 = vst.msk [vmem:[%s284_s6] sm:$0xff] %vm513_vm1, %v503_v45 }
 0x19b   : > { %v512_v46 = vpop.xlane.xlu1 %511  ;;  %v506_v47 = vpop.xlane.xlu0 %505 }
 0x19c   : > { %517 = vst.msk [vmem:[%s284_s6 + $0x18] sm:$0xff] %vm513_vm1, %v512_v46  ;;  %515 = vst.msk [vmem:[%s284_s6 + $0x8] sm:$0xff] %vm513_vm1, %v506_v47 }
 0x19f   : > { %v527_v48 = vpop.xlane.xlu1 %526  ;;  %v524_v49 = vpop.xlane.xlu0 %523 }
 0x1a0   : > { %535 = vst.msk [vmem:[%s293_s9 + $0x8] sm:$0xff] %vm513_vm1, %v527_v48  ;;  %534 = vst.msk [vmem:[%s293_s9] sm:$0xff] %vm513_vm1, %v524_v49 }
 0x1a3   : > { %v533_v50 = vpop.xlane.xlu1 %532  ;;  %v530_v51 = vpop.xlane.xlu0 %529 }
 0x1a4   : > { %537 = vst.msk [vmem:[%s293_s9 + $0x18] sm:$0xff] %vm513_vm1, %v533_v50  ;;  %536 = vst.msk [vmem:[%s293_s9 + $0x10] sm:$0xff] %vm513_vm1, %v530_v51 }
 0x1a5 PF: > { %s15_s17 = sadd.s32 1, %s893_s17   ;;  %s1011_s15 = smov %s889_s16 }
 0x1a6   : > { %p12_p5 = scmp.ge.s32.totalorder %s15_s17, 6   ;;  %s1012_s16 = smov %s1014_s18 }
 0x1a8   :  { %14 = sbr.rel (!%p12_p5) target bundleno = 2 (0x2), region = 85 }

// kernel: generator_forward.10
= control target key start
LH: loop header
LB: loop body
LE: loop exit
PB: predicated region body
PF: predicated region fallthrough
CT: control target
= control target key end

     0   :  { %v89_v0 = vmov 0   ;;  %s158_s1 = inlined_call_operand.vmem [shape: f32[32,1], index: 1, kind: input, shape index: {}]   ;;  %s159_s2 = inlined_call_operand.vmem [shape: f32[32,1], index: 2, kind: input, shape index: {}]   ;;  %s160_s0 = inlined_call_operand.vmem [shape: f32[32,128], index: 0, kind: input, shape index: {}]   ;;  %s161_s3 = inlined_call_operand.vmem [shape: f32[32,128], index: 3, kind: output, shape index: {}]  }
   0x1   :  { %88 = vset.pattern.permute.xlu1 %v89_v0  ;;  %87 = vset.pattern.permute.xlu0 %v89_v0  ;;  %v20_v1 = vld [vmem:[%s158_s1 + $0x10] sm:$0xff]  ;;  %v18_v2 = vld [vmem:[%s158_s1] sm:$0xff]  ;;  %v21_v3 = vld [vmem:[%s158_s1 + $0x18] sm:$0xff] }
   0x2   :  { %34 = vperm.xlu1 %88, %v20_v1   ;;  %24 = vperm.xlu0 %87, %v18_v2   ;;  %v19_v4 = vld [vmem:[%s158_s1 + $0x8] sm:$0xff]  ;;  %v46_v6 = vld [vmem:[%s159_s2] sm:$0xff]  ;;  %v49_v7 = vld [vmem:[%s159_s2 + $0x18] sm:$0xff] }
   0x3   :  { %v47_v5 = vld [vmem:[%s159_s2 + $0x8] sm:$0xff]  ;;  %v48_v8 = vld [vmem:[%s159_s2 + $0x10] sm:$0xff]  ;;  %v14_v11 = vld [vmem:[%s160_s0] sm:$0xff] }
   0x4   :  { %v15_v14 = vld [vmem:[%s160_s0 + $0x8] sm:$0xff]  ;;  %v16_v17 = vld [vmem:[%s160_s0 + $0x10] sm:$0xff]  ;;  %v17_v18 = vld [vmem:[%s160_s0 + $0x18] sm:$0xff] }
   0x6   :  { %39 = vperm.xlu1 %88, %v21_v3   ;;  %29 = vperm.xlu0 %87, %v19_v4  }
   0xa   :  { %57 = vperm.xlu1 %88, %v47_v5   ;;  %52 = vperm.xlu0 %87, %v46_v6  }
   0xe   :  { %67 = vperm.xlu1 %88, %v49_v7   ;;  %62 = vperm.xlu0 %87, %v48_v8  }
  0x81   :  { %v35_v9 = vpop.permute.xlu1 %34  ;;  %v25_v10 = vpop.permute.xlu0 %24 }
  0x82   :  { %v42_v15 = vmul.f32 %v25_v10, %v14_v11  ;;  %v44_v23 = vmul.f32 %v35_v9, %v16_v17 }
  0x85   :  { %v40_v12 = vpop.permute.xlu1 %39  ;;  %v30_v13 = vpop.permute.xlu0 %29 }
  0x86   :  { %v43_v16 = vmul.f32 %v30_v13, %v15_v14  ;;  %v45_v24 = vmul.f32 %v40_v12, %v17_v18 }
  0x89   :  { %v58_v19 = vpop.permute.xlu1 %57  ;;  %v53_v20 = vpop.permute.xlu0 %52 }
  0x8a   :  { %v71_v21 = vadd.f32 %v58_v19, %v43_v16  ;;  %v70_v22 = vadd.f32 %v53_v20, %v42_v15 }
  0x8c   :  { %v75_v25 = vmax.f32 %v71_v21, 0.0  ;;  %v74_v26 = vmax.f32 %v70_v22, 0.0 }
  0x8d   :  { %v68_v27 = vpop.permute.xlu1 %67  ;;  %v63_v28 = vpop.permute.xlu0 %62 }
  0x8e   :  { %79 = vst [vmem:[%s161_s3 + $0x8] sm:$0xff] %v75_v25  ;;  %78 = vst [vmem:[%s161_s3] sm:$0xff] %v74_v26  ;;  %v73_v29 = vadd.f32 %v68_v27, %v45_v24  ;;  %v72_v30 = vadd.f32 %v63_v28, %v44_v23 }
  0x90   :  { %v77_v31 = vmax.f32 %v73_v29, 0.0  ;;  %v76_v32 = vmax.f32 %v72_v30, 0.0 }
  0x92   :  { %81 = vst [vmem:[%s161_s3 + $0x18] sm:$0xff] %v77_v31  ;;  %80 = vst [vmem:[%s161_s3 + $0x10] sm:$0xff] %v76_v32 }

// kernel: generator_forward.11
= control target key start
LH: loop header
LB: loop body
LE: loop exit
PB: predicated region body
PF: predicated region fallthrough
CT: control target
= control target key end

     0   :  { %s772_s15 = smov 0   ;;  %s774_s16 = smov 0   ;;  %s814_s0 = inlined_call_operand.vmem [shape: bf16[4,128,128], index: 0, kind: input, shape index: {}]   ;;  %s815_s1 = inlined_call_operand.vmem [shape: bf16[4,16,128], index: 1, kind: input, shape index: {}]   ;;  %s816_s2 = inlined_call_operand.vmem [shape: f32[4,16,128], index: 2, kind: output, shape index: {0}]   ;;  %s817_s3 = inlined_call_operand.vmem [shape: f32[4,1,16,1], index: 3, kind: output, shape index: {1}]   ;;  %s818_s4 = inlined_call_operand.vmem [shape: f32[4,1,16,1], index: 4, kind: output, shape index: {2}]  }
   0x1   :  { %s776_s17 = smov 0  }
   0x2 LB: > { %s27_s18 = sadd.s32 1, %s739_s16  ;;  %p630_p0 = scmp.ge.s32.totalorder %s743_s17, 1  ;;  %s743_s17 = sphi %s776_s17, %s15_s17   ;;  %s739_s16 = sphi %s774_s16, %s820_s16   ;;  %s735_s15 = sphi %s772_s15, %s819_s15  }
   0x3   : > { %p29_p1 = scmp.ge.s32.totalorder %s27_s18, 4  ;;  %p200_p2 = scmp.lt.s32.totalorder %s743_s17, 5 }
   0x5   : > { %s822_s18 = smov (%p29_p1, %s27_s18), 0  ;;  %p201_p3 = pnand %p630_p0, %p200_p2 }
   0x6   : > { %p255_p4 = scmp.lt.s32.totalorder (!%p201_p3), %s735_s15, 3  ;;  %v745_v0 = vmov (!%p201_p3), 0.0   ;;  %vm746_vm0 = vmmov (!%p201_p3), 0   ;;  %vm414_vm1 = vcmask (!%p201_p3), 7168  }
   0x7   : > { %204 = sbr.rel (%p201_p3) target bundleno = 410 (0x19a), region = 28  ;;  %666 = vmatprep.subr.bf16.mxu0 (!%p201_p3), %v745_v0  ;;  %682 = vmatprep.mubr.msk.bf16.mxu0 (!%p201_p3), %vm746_vm0, %v745_v0 }
   0xe   : > { %s824_s15 = smov (!%p255_p4, %s735_s15), 3 }
   0xf   : > { %s652_s19 = sshll.u32 %s824_s15, 6  ;;  %s653_s23 = sshll.u32 %s824_s15, 3 }
  0x10   : > { %s262_s22 = scalar_lea.vmem %s814_s0, %s652_s19  ;;  %s267_s26 = scalar_lea.vmem %s815_s1, %s653_s23 }
  0x11   : > { %v712_v1 = vld [vmem:[%s262_s22] sm:$0xff]   ;;  %v713_v2 = vld [vmem:[%s262_s22 + $0x8] sm:$0xff]   ;;  %v714_v3 = vld [vmem:[%s262_s22 + $0x10] sm:$0xff]   ;;  %s654_s27 = sshll.u32 %s824_s15, 4 }
  0x12   : > { %667 = vmatpush3.bf16.msra.mxu0 %v712_v1  ;;  %v715_v4 = vld [vmem:[%s262_s22 + $0x18] sm:$0xff]   ;;  %v716_v5 = vld [vmem:[%s262_s22 + $0x20] sm:$0xff]   ;;  %v717_v6 = vld [vmem:[%s262_s22 + $0x28] sm:$0xff]   ;;  %s275_s30 = scalar_lea.vmem %s816_s2, %s654_s27  ;;  %s284_s7 = scalar_lea.vmem %s817_s3, %s654_s27 }
  0x13   : > { %668 = vmatprep.subr.bf16.mxu0 %v745_v0  ;;  %v718_v7 = vld [vmem:[%s262_s22 + $0x30] sm:$0xff]   ;;  %v719_v8 = vld [vmem:[%s262_s22 + $0x38] sm:$0xff]   ;;  %v720_v9 = vld [vmem:[%s267_s26] sm:$0xff]   ;;  %s293_s10 = scalar_lea.vmem %s818_s4, %s654_s27 }
  0x16   : > { %669 = vmatpush3.bf16.msra.mxu0 %v713_v2 }
  0x17   : > { %670 = vmatprep.subr.bf16.mxu0 %v745_v0 }
  0x1a   : > { %671 = vmatpush3.bf16.msra.mxu0 %v714_v3 }
  0x1b   : > { %672 = vmatprep.subr.bf16.mxu0 %v745_v0 }
  0x1e   : > { %673 = vmatpush3.bf16.msra.mxu0 %v715_v4 }
  0x1f   : > { %674 = vmatprep.subr.bf16.mxu0 %v745_v0 }
  0x22   : > { %675 = vmatpush3.bf16.msra.mxu0 %v716_v5 }
  0x23   : > { %676 = vmatprep.subr.bf16.mxu0 %v745_v0 }
  0x26   : > { %677 = vmatpush3.bf16.msra.mxu0 %v717_v6 }
  0x27   : > { %678 = vmatprep.subr.bf16.mxu0 %v745_v0 }
  0x2a   : > { %679 = vmatpush3.bf16.msra.mxu0 %v718_v7 }
  0x2b   : > { %680 = vmatprep.subr.bf16.mxu0 %v745_v0 }
  0x2e   : > { %681 = vmatpush3.bf16.msra.mxu0 %v719_v8 }
  0x31   : > { %683 = vmatmul.mubr.bf16.vlgmr.msra.gmra.mrb[0].mxu0 %v720_v9 }
 0x104   : > { %v401_v10 = vpop.f32.mrb[0].mxu0 }
 0x105   : > { %408 = vst [vmem:[%s275_s30] sm:$0xff] %v401_v10  ;;  %410 = vadd.xlane.f32.xlu0 %v401_v10  ;;  %v684_v11 = vpop.f32.mrb[1].mxu0  ;;  %v417_v12 = vmul.f32 %v401_v10, %v401_v10 }
 0x106   : > { %v404_v13 = vpop.f32.mrb[2].mxu0 }
 0x107   : > { %409 = vst [vmem:[%s275_s30 + $0x8] sm:$0xff] %v404_v13  ;;  %419 = vadd.xlane.f32.xlu1 %v417_v12  ;;  %v685_v14 = vpop.f32.mrb[3].mxu0  ;;  %v418_v15 = vmul.f32 %v404_v13, %v404_v13 }
 0x109   : > { %412 = vadd.xlane.f32.xlu0 %v404_v13 }
 0x10b   : > { %421 = vadd.xlane.f32.xlu1 %v418_v15 }
 0x192   : > { %v411_v16 = vpop.xlane.xlu0 %410 }
 0x193   : > { %415 = vst.msk [vmem:[%s284_s7] sm:$0xff] %vm414_vm1, %v411_v16 }
 0x194   : > { %v420_v17 = vpop.xlane.xlu1 %419 }
 0x195   : > { %423 = vst.msk [vmem:[%s293_s10] sm:$0xff] %vm414_vm1, %v420_v17 }
 0x196   : > { %v413_v18 = vpop.xlane.xlu0 %412 }
 0x197   : > { %416 = vst.msk [vmem:[%s284_s7 + $0x8] sm:$0xff] %vm414_vm1, %v413_v18 }
 0x198   : > { %v422_v19 = vpop.xlane.xlu1 %421 }
 0x199   : > { %424 = vst.msk [vmem:[%s293_s10 + $0x8] sm:$0xff] %vm414_vm1, %v422_v19 }
 0x19a PF: > { %s15_s17 = sadd.s32 1, %s743_s17   ;;  %s819_s15 = smov %s739_s16 }
 0x19b   : > { %p12_p5 = scmp.ge.s32.totalorder %s15_s17, 6   ;;  %s820_s16 = smov %s822_s18 }
 0x19d   :  { %14 = sbr.rel (!%p12_p5) target bundleno = 2 (0x2), region = 85 }

// kernel: generator_forward.12
= control target key start
LH: loop header
LB: loop body
LE: loop exit
PB: predicated region body
PF: predicated region fallthrough
CT: control target
= control target key end

     0   :  { %s415_s12 = smov 0   ;;  %s417_s13 = smov 0   ;;  %s487_s0 = inlined_call_operand.vmem [shape: f32[16,512], index: 0, kind: input, shape index: {}]   ;;  %s488_s1 = inlined_call_operand.vmem [shape: f32[16,1], index: 1, kind: input, shape index: {}]   ;;  %s489_s2 = inlined_call_operand.vmem [shape: f32[16,1], index: 2, kind: input, shape index: {}]   ;;  %s490_s3 = inlined_call_operand.vmem [shape: f32[16,512], index: 3, kind: output, shape index: {}]  }
   0x1   :  { %s419_s14 = smov 0  }
   0x2 LB: > { %s326_s15 = sadd.s32 4294967295, %s392_s14   ;;  %s432_s16 = sadd.s32 1, %s392_s14   ;;  %s392_s14 = sphi %s419_s14, %s494_s14   ;;  %s388_s13 = sphi %s417_s13, %s493_s13   ;;  %s384_s12 = sphi %s415_s12, %s492_s12  }
   0x3   : > { %s17_s17 = ssub.s32 %s392_s14, %s432_s16  ;;  %s20_s18 = sadd.s32 1, %s388_s13 }
   0x4   : > { %p18_p0 = scmp.eq.s32.totalorder %s17_s17, 0  ;;  %p27_p1 = scmp.ne.s32.totalorder %s388_s13, %s384_s12 }
   0x5   : > { %p28_p2 = scmp.eq.s32.totalorder %s392_s14, 0  ;;  %p99_p3 = scmp.eq.s32.totalorder %s326_s15, 1 }
   0x6   : > { %s443_s19 = scalar_select %p18_p0, %s388_s13, %s20_s18  }
   0x7   : > { %p29_p4 = por %p28_p2, %p27_p1  ;;  %p445_p5 = por %p99_p3, %p27_p1 }
   0x8   : > { %p329_p6 = scmp.ge.s32.totalorder %s392_s14, 2 }
   0xa   : > { %127 = sbr.rel (%p329_p6) target bundleno = 24 (0x18), region = 24 }
  0x11   : > { %130 = sbr.rel (!%p29_p4) target bundleno = 24 (0x18), region = 28  ;;  %s132_s21 = sand.u32 (%p29_p4), 1, %s388_s13  }
  0x12   : > { %s341_s22 = sshll.u32 (%p29_p4), %s392_s14, 4  ;;  %s330_s23 = sshll.u32 (%p29_p4), %s132_s21, 5 }
  0x13   : > { %s137_s26 = scalar_lea.vmem (%p29_p4), %s487_s0, %s341_s22  ;;  %s134_s27 = scalar_lea.vmem (%p29_p4), [#allocation2], %s330_s23 }
  0x14   : > { %v150_v0 = vld [vmem:[%s137_s26] sm:$0xff] (%p29_p4)  ;;  %v152_v1 = vld [vmem:[%s137_s26 + $0x8] sm:$0xff] (%p29_p4) }
  0x15   : > { %v154_v2 = vld [vmem:[%s137_s26 + $0x20] sm:$0xff] (%p29_p4)  ;;  %151 = vst [vmem:[%s134_s27] sm:$0xff] (%p29_p4), %v150_v0  ;;  %153 = vst [vmem:[%s134_s27 + $0x8] sm:$0xff] (%p29_p4), %v152_v1  ;;  %v156_v3 = vld [vmem:[%s137_s26 + $0x28] sm:$0xff] (%p29_p4) }
  0x16   : > { %155 = vst [vmem:[%s134_s27 + $0x10] sm:$0xff] (%p29_p4), %v154_v2  ;;  %157 = vst [vmem:[%s134_s27 + $0x18] sm:$0xff] (%p29_p4), %v156_v3 }
  0x18 PF: > { %p333_p7 = scmp.ge.s32.totalorder %s392_s14, 1  ;;  %p162_p8 = scmp.lt.s32.totalorder %s392_s14, 3 }
  0x1a   : > { %p163_p9 = pnand %p333_p7, %p162_p8 }
  0x1b   : > { %v213_v4 = vld [vmem:[%s489_s2] sm:$0xff] (!%p163_p9)  ;;  %v394_v6 = vmov (!%p163_p9), 0   ;;  %v214_v7 = vld [vmem:[%s489_s2 + $0x8] sm:$0xff] (!%p163_p9)  ;;  %s169_s9 = sand.u32 (!%p163_p9), 1, %s384_s12  }
  0x1c   : > { %166 = sbr.rel (%p163_p9) target bundleno = 176 (0xb0), region = 51  ;;  %v197_v5 = vld [vmem:[%s488_s1] sm:$0xff] (!%p163_p9)  ;;  %369 = vset.pattern.permute.xlu1 (!%p163_p9), %v394_v6  ;;  %368 = vset.pattern.permute.xlu0 (!%p163_p9), %v394_v6  ;;  %v198_v8 = vld [vmem:[%s488_s1 + $0x8] sm:$0xff] (!%p163_p9)  ;;  %s334_s10 = sshll.u32 (!%p163_p9), %s169_s9, 5 }
  0x1d   : > { %217 = vperm.xlu1 (!%p163_p9), %369, %v213_v4   ;;  %201 = vperm.xlu0 (!%p163_p9), %368, %v197_v5   ;;  %s171_s11 = scalar_lea.vmem (!%p163_p9), [#allocation2], %s334_s10  ;;  %s190_s17 = scalar_lea.vmem (!%p163_p9), [#allocation3], %s334_s10 }
  0x1e   : > { %v193_v9 = vld [vmem:[%s171_s11] sm:$0xff] (!%p163_p9)  ;;  %v194_v10 = vld [vmem:[%s171_s11 + $0x8] sm:$0xff] (!%p163_p9)  ;;  %v195_v15 = vld [vmem:[%s171_s11 + $0x10] sm:$0xff] (!%p163_p9) }
  0x1f   : > { %v196_v16 = vld [vmem:[%s171_s11 + $0x18] sm:$0xff] (!%p163_p9) }
  0x21   : > { %222 = vperm.xlu1 (!%p163_p9), %369, %v214_v7   ;;  %206 = vperm.xlu0 (!%p163_p9), %368, %v198_v8  }
  0x23   : > { %s342_s12 = sshll.u32 (%p445_p5), %s326_s15, 4 }
  0x24   : > { %s246_s22 = scalar_lea.vmem (%p445_p5), %s490_s3, %s342_s12 }
  0x9c   : > { %v218_v11 = vpop.permute.xlu1 %217  ;;  %v202_v12 = vpop.permute.xlu0 %201 }
  0x9d   : > { %v209_v13 = vmul.f32 %v202_v12, %v193_v9  ;;  %v210_v14 = vmul.f32 %v202_v12, %v194_v10 }
  0x9f   : > { %v225_v17 = vadd.f32 %v218_v11, %v209_v13  ;;  %v226_v18 = vadd.f32 %v218_v11, %v210_v14 }
  0xa0   : > { %v207_v19 = vpop.permute.xlu0 %206  ;;  %v223_v24 = vpop.permute.xlu1 %222 }
  0xa1   : > { %v229_v20 = vmax.f32 %v225_v17, 0.0  ;;  %v230_v21 = vmax.f32 %v226_v18, 0.0  ;;  %v211_v22 = vmul.f32 %v207_v19, %v195_v15  ;;  %v212_v23 = vmul.f32 %v207_v19, %v196_v16  ;;  %243 = sbr.rel (!%p445_p5) target bundleno = 176 (0xb0), region = 59 }
  0xa3   : > { %233 = vst [vmem:[%s190_s17] sm:$0xff] %v229_v20  ;;  %234 = vst [vmem:[%s190_s17 + $0x8] sm:$0xff] %v230_v21  ;;  %v227_v25 = vadd.f32 %v223_v24, %v211_v22  ;;  %v228_v26 = vadd.f32 %v223_v24, %v212_v23 }
  0xa5   : > { %v231_v27 = vmax.f32 %v227_v25, 0.0  ;;  %v232_v28 = vmax.f32 %v228_v26, 0.0 }
  0xa7   : > { %235 = vst [vmem:[%s190_s17 + $0x10] sm:$0xff] %v231_v27  ;;  %236 = vst [vmem:[%s190_s17 + $0x18] sm:$0xff] %v232_v28 }
  0xaa   : > { %v259_v29 = vld [vmem:[%s190_s17] sm:$0xff]  ;;  %v261_v30 = vld [vmem:[%s190_s17 + $0x8] sm:$0xff] }
  0xab   : > { %260 = vst [vmem:[%s246_s22] sm:$0xff] %v259_v29  ;;  %262 = vst [vmem:[%s246_s22 + $0x8] sm:$0xff] %v261_v30 }
  0xae   : > { %v263_v31 = vld [vmem:[%s190_s17 + $0x10] sm:$0xff]  ;;  %v265_v32 = vld [vmem:[%s190_s17 + $0x18] sm:$0xff] }
  0xaf   : > { %264 = vst [vmem:[%s246_s22 + $0x20] sm:$0xff] %v263_v31  ;;  %266 = vst [vmem:[%s246_s22 + $0x28] sm:$0xff] %v265_v32 }
  0xb0 PF: > { %p10_p10 = scmp.ge.s32.totalorder %s432_s16, 4   ;;  %s492_s12 = smov %s388_s13 }
  0xb1   : > { %s493_s13 = smov %s443_s19  ;;  %s494_s14 = smov %s432_s16 }
  0xb2   :  { %12 = sbr.rel (!%p10_p10) target bundleno = 2 (0x2), region = 113 }

// kernel: generator_forward.13
= control target key start
LH: loop header
LB: loop body
LE: loop exit
PB: predicated region body
PF: predicated region fallthrough
CT: control target
= control target key end

     0   :  { %s668_s12 = smov 0   ;;  %s670_s13 = smov 0   ;;  %s764_s0 = inlined_call_operand.vmem [shape: bf16[4,64,512], index: 0, kind: input, shape index: {}]   ;;  %s765_s1 = inlined_call_operand.vmem [shape: bf16[4,3,64], index: 1, kind: input, shape index: {}]   ;;  %s766_s2 = inlined_call_operand.vmem [shape: f32[3,1], index: 2, kind: input, shape index: {}]   ;;  %s767_s3 = inlined_call_operand.vmem [shape: f32[4,3,512], index: 3, kind: output, shape index: {}]  }
   0x1   :  { %s672_s14 = smov 0   ;;  %s674_s15 = smov 0  }
   0x2   :  { %s676_s16 = smov 0   ;;  %s678_s17 = smov 0  }
   0x3   :  { %s680_s18 = smov 0  }
   0x4 LB: > { %s22_s19 = sadd.s32 1, %s637_s16  ;;  %s25_s20 = sadd.s32 1, %s641_s17  ;;  %s645_s18 = sphi %s680_s18, %s13_s18   ;;  %s641_s17 = sphi %s678_s17, %s773_s17   ;;  %s637_s16 = sphi %s676_s16, %s772_s16   ;;  %s633_s15 = sphi %s674_s15, %s771_s15   ;;  %s629_s14 = sphi %s672_s14, %s770_s14   ;;  %s625_s13 = sphi %s670_s13, %s769_s13   ;;  %s621_s12 = sphi %s668_s12, %s768_s12  }
   0x5   : > { %p23_p0 = scmp.ge.s32.totalorder %s22_s19, 2  ;;  %p41_p1 = scmp.ne.s32.totalorder %s625_s13, %s621_s12 }
   0x6   : > { %p42_p2 = scmp.eq.s32.totalorder %s645_s18, 0  ;;  %s34_s24 = sadd.s32 1, %s625_s13 }
   0x7   : > { %s775_s19 = smov (%p23_p0, %s22_s19), 0  ;;  %s777_s20 = smov (!%p23_p0, %s25_s20), %s641_s17 }
   0x8   : > { %p43_p3 = por %p42_p2, %p41_p1  ;;  %p27_p4 = scmp.ge.s32.totalorder %s777_s20, 4 }
   0x9   : > { %s30_s21 = ssub.s32 %s637_s16, %s775_s19  ;;  %p495_p6 = scmp.ge.s32.totalorder %s645_s18, 8 }
   0xa   : > { %s779_s20 = smov (%p27_p4, %s777_s20), 0 }
   0xb   : > { %s29_s22 = ssub.s32 %s641_s17, %s779_s20  ;;  %145 = sbr.rel (%p495_p6) target bundleno = 29 (0x1d), region = 20 }
   0xc   : > { %s31_s23 = sor.u32 %s30_s21, %s29_s22 }
   0xd   : > { %p32_p5 = scmp.eq.s32.totalorder %s31_s23, 0 }
   0xf   : > { %s719_s25 = scalar_select %p32_p5, %s625_s13, %s34_s24  }
  0x12   : > { %148 = sbr.rel (!%p43_p3) target bundleno = 29 (0x1d), region = 24  ;;  %s150_s26 = sand.u32 (%p43_p3), 1, %s625_s13  }
  0x13   : > { %s497_s27 = sshll.u32 (%p43_p3), %s637_s16, 1  ;;  %s496_s28 = sshll.u32 (%p43_p3), %s150_s26, 6 }
  0x14   : > { %s498_s29 = sshll.u32 (%p43_p3), %s641_s17, 5  ;;  %s152_s8 = scalar_lea.vmem (%p43_p3), [#allocation2], %s496_s28 }
  0x15   : > { %s155_s30 = sadd.s32 (%p43_p3), %s498_s29, %s497_s27 }
  0x16   : > { %s499_s4 = sshll.u32 (%p43_p3), %s155_s30, 2 }
  0x17   : > { %s157_s7 = scalar_lea.vmem (%p43_p3), %s764_s0, %s499_s4 }
  0x18   : > { %v199_v0 = vld [vmem:[%s157_s7] sm:$0xff] (%p43_p3)  ;;  %v201_v1 = vld [vmem:[%s157_s7 + $0x10] sm:$0xff] (%p43_p3) }
  0x19   : > { %v203_v2 = vld [vmem:[%s157_s7 + $0x20] sm:$0xff]  ;;  %200 = vst [vmem:[%s152_s8] sm:$0xff] %v199_v0  ;;  %202 = vst [vmem:[%s152_s8 + $0x8] sm:$0xff] %v201_v1  ;;  %v205_v3 = vld [vmem:[%s157_s7 + $0x30] sm:$0xff] }
  0x1a   : > { %204 = vst [vmem:[%s152_s8 + $0x10] sm:$0xff] %v203_v2  ;;  %v207_v4 = vld [vmem:[%s157_s7 + $0x40] sm:$0xff]  ;;  %v209_v5 = vld [vmem:[%s157_s7 + $0x50] sm:$0xff]  ;;  %206 = vst [vmem:[%s152_s8 + $0x18] sm:$0xff] %v205_v3 }
  0x1b   : > { %208 = vst [vmem:[%s152_s8 + $0x20] sm:$0xff] %v207_v4  ;;  %210 = vst [vmem:[%s152_s8 + $0x28] sm:$0xff] %v209_v5  ;;  %v211_v6 = vld [vmem:[%s157_s7 + $0x60] sm:$0xff]  ;;  %v213_v7 = vld [vmem:[%s157_s7 + $0x70] sm:$0xff] }
  0x1c   : > { %212 = vst [vmem:[%s152_s8 + $0x30] sm:$0xff] %v211_v6  ;;  %214 = vst [vmem:[%s152_s8 + $0x38] sm:$0xff] %v213_v7 }
  0x1d PF: > { %p500_p7 = scmp.ge.s32.totalorder %s645_s18, 1  ;;  %p226_p8 = scmp.lt.s32.totalorder %s645_s18, 9 }
  0x1f   : > { %p227_p9 = pnand %p500_p7, %p226_p8 }
  0x20   : > { %s233_s9 = sand.u32 (!%p227_p9), 1, %s621_s12   ;;  %v289_v8 = vld [vmem:[%s766_s2] sm:$0x7] (!%p227_p9)  ;;  %v647_v9 = vmov (!%p227_p9), 0   ;;  %p265_p10 = scmp.lt.s32.totalorder (!%p227_p9), %s633_s15, 3  ;;  %vm335_vm0 = vcmask (!%p227_p9), 523264  }
  0x21   : > { %230 = sbr.rel (%p227_p9) target bundleno = 281 (0x119), region = 66  ;;  %s501_s21 = sshll.u32 (!%p227_p9), %s233_s9, 6  ;;  %371 = vmatprep.mubr.bf16.mxu0 (!%p227_p9), %v647_v9  ;;  %574 = vset.pattern.permute.xlu0 (!%p227_p9), %v647_v9 }
  0x22   : > { %292 = vperm.xlu0 (!%p227_p9), %574, %v289_v8   ;;  %s235_s22 = scalar_lea.vmem (!%p227_p9), [#allocation2], %s501_s21  ;;  %s503_s27 = sshll.u32 (!%p227_p9), %s629_s14, 1 }
  0x23   : > { %v575_v10 = vld [vmem:[%s235_s22 + $0x4] ss:$8 sps:$4 sm:$0xff] (!%p227_p9)   ;;  %v577_v11 = vld [vmem:[%s235_s22] ss:$8 sps:$4 sm:$0xff] (!%p227_p9)   ;;  %v578_v12 = vld [vmem:[%s235_s22 + $0x14] ss:$8 sps:$4 sm:$0xff] (!%p227_p9)  }
  0x24   : > { %339 = vmatprep.subr.bf16.mxu0 (!%p227_p9), %v575_v10  ;;  %v580_v13 = vld [vmem:[%s235_s22 + $0x10] ss:$8 sps:$4 sm:$0xff] (!%p227_p9)   ;;  %v581_v14 = vld [vmem:[%s235_s22 + $0x24] ss:$8 sps:$4 sm:$0xff] (!%p227_p9)   ;;  %v583_v15 = vld [vmem:[%s235_s22 + $0x20] ss:$8 sps:$4 sm:$0xff] (!%p227_p9)  }
  0x25   : > { %340 = vmatpush1.bf16.msra.mxu0 (!%p227_p9), %v577_v11  ;;  %v584_v16 = vld [vmem:[%s235_s22 + $0x34] ss:$8 sps:$4 sm:$0xff] (!%p227_p9)   ;;  %v586_v17 = vld [vmem:[%s235_s22 + $0x30] ss:$8 sps:$4 sm:$0xff] (!%p227_p9)   ;;  %p272_p11 = scmp.lt.s32.totalorder (!%p227_p9), %s503_s27, 3 }
  0x26   : > { %341 = vmatprep.subr.bf16.mxu0 (!%p227_p9), %v578_v12 }
  0x28   : > { %s781_s15 = smov (!%p265_p10, %s633_s15), 3  ;;  %s783_s27 = smov (!%p272_p11, %s503_s27), 3 }
  0x29   : > { %342 = vmatpush1.bf16.msra.mxu0 %v580_v13  ;;  %s502_s12 = sshll.u32 %s781_s15, 1  ;;  %s504_s28 = sshll.u32 %s781_s15, 2 }
  0x2a   : > { %343 = vmatprep.subr.bf16.mxu0 %v581_v14  ;;  %s268_s26 = scalar_lea.vmem %s765_s1, %s502_s12  ;;  %s275_s29 = sadd.s32 %s504_s28, %s783_s27 }
  0x2b   : > { %v280_v18 = vld [vmem:[%s268_s26] sm:$0x3]  ;;  %s505_s30 = sshll.u32 %s275_s29, 2 }
  0x2c   : > { %s277_s14 = scalar_lea.vmem %s767_s3, %s505_s30 }
  0x2d   : > { %344 = vmatpush1.bf16.msra.mxu0 %v583_v15 }
  0x2e   : > { %345 = vmatprep.subr.bf16.mxu0 %v584_v16 }
  0x31   : > { %346 = vmatpush1.bf16.msra.mxu0 %v586_v17 }
  0x34   : > { %514 = vmatmul.mubr.msk.bf16.vlgmr.msra.gmra.mrb[0].mxu0 %vm335_vm0, %v280_v18 }
  0xa1   : > { %v293_v19 = vpop.permute.xlu0 %292 }
 0x107   : > { %v373_v20 = vpop.f32.mrb[0].mxu0 }
 0x108   : > { %v374_v21 = vadd.f32 %v373_v20, %v293_v19  ;;  %v375_v22 = vpop.f32.mrb[1].mxu0 }
 0x109   : > { %v376_v23 = vadd.f32 %v375_v22, %v293_v19  ;;  %v377_v24 = vpop.f32.mrb[2].mxu0 }
 0x10a   : > { %587 = vtanh.f32 %v374_v21  ;;  %v378_v25 = vpop.f32.mrb[3].mxu0 }
 0x10b   : > { %589 = vtanh.f32 %v376_v23 }
 0x114   : > { %v588_v26 = vpop.eup %587 }
 0x115   : > { %v590_v27 = vpop.eup %589 }
 0x116   : > { %v384_v28 = vcombine.low %v588_v26, %v590_v27 }
 0x118   : > { %386 = vst [vmem:[%s277_s14] sm:$0x77] %v384_v28 }
 0x119 PF: > { %s13_s18 = sadd.s32 1, %s645_s18   ;;  %s768_s12 = smov %s625_s13 }
 0x11a   : > { %p10_p12 = scmp.ge.s32.totalorder %s13_s18, 10   ;;  %s769_s13 = smov %s719_s25 }
 0x11b   : > { %s770_s14 = smov %s637_s16  ;;  %s771_s15 = smov %s641_s17 }
 0x11c   : > { %s772_s16 = smov %s775_s19  ;;  %s773_s17 = smov %s779_s20 }
 0x11d   :  { %12 = sbr.rel (!%p10_p12) target bundleno = 4 (0x4), region = 108 }

</bundles_post_ra>
